<compile_context>
chip_gen: v6e
topology: v6e:2x2x1
jax: 0.10.0
libtpu: 0.0.40
codegen_flags: <defaults>
</compile_context>

<pallas_src>
import math
import functools

import jax
import jax.numpy as jnp
from jax.experimental import pallas as pl
from jax.experimental.pallas import tpu as pltpu


# ----------------------------- small math helpers ---------------------------
def _erf(x):
    # Abramowitz & Stegun 7.1.26 (max abs err ~1.5e-7), built only from
    # exp / mul / add which lower cleanly in Mosaic.
    # TODO(synk): PyTorch 'gelu' uses exact erf; this approximation differs by <2e-7.
    a1, a2, a3, a4, a5 = 0.254829592, -0.284496736, 1.421413741, -1.453152027, 1.061405429
    p = 0.3275911
    s = jnp.where(x >= 0.0, 1.0, -1.0)
    zz = jnp.abs(x)
    t = 1.0 / (1.0 + p * zz)
    poly = t * (a1 + t * (a2 + t * (a3 + t * (a4 + t * a5))))
    return s * (1.0 - poly * jnp.exp(-zz * zz))


def _gelu(x):
    return 0.5 * x * (1.0 + _erf(x * (1.0 / math.sqrt(2.0))))


def _layernorm(x, g, b, eps=1e-5):
    mu = jnp.mean(x, axis=-1, keepdims=True)
    xc = x - mu
    var = jnp.mean(xc * xc, axis=-1, keepdims=True)
    return xc * jax.lax.rsqrt(var + eps) * g + b


def positional_encoding(seq_len, d_model):
    pos = jnp.arange(seq_len, dtype=jnp.float32)[:, None]
    i2 = jnp.arange(0, d_model, 2, dtype=jnp.float32)
    angle = pos / jnp.power(10000.0, i2 / d_model)
    pe = jnp.zeros((seq_len, d_model), jnp.float32)
    pe = pe.at[:, 0::2].set(jnp.sin(angle))
    pe = pe.at[:, 1::2].set(jnp.cos(angle))
    return pe


def _round_up(x, m):
    return ((x + m - 1) // m) * m


# --------------------------------- kernel -----------------------------------
def motion_decoder_kernel(x0_ref, z_ref, bias_ref, hmask_ref, omask_ref,
                          sa_w_ref, sa_b_ref, sa_wo_ref, ca_w_ref,
                          w1_ref, b1_ref, w2_ref, vecs_ref, wf_ref, bf_ref,
                          o_ref, *, n_layer, n_head, d_model):
    BS = x0_ref.shape[0]                     # batch * seq rows
    dh = d_model // n_head
    scale = 1.0 / math.sqrt(dh)

    x = x0_ref[...]                          # tgt = zeros + positional encoding
    z_rep = z_ref[...]                       # latent memory repeated per row
    bias = bias_ref[...]                     # (H*BS, BS): 0 valid, -1e30 pad/cross-batch
    hmask = hmask_ref[...]                   # (H*BS, D) block-diagonal head mask
    q_mask = hmask * scale                   # fold 1/sqrt(dh) into the Q expansion

    for l in range(n_layer):
        vec = vecs_ref[l]                    # (9, D) packed per-layer vectors
        sa_bo, ca_b, b2 = vec[0:1], vec[1:2], vec[2:3]
        g1, be1 = vec[3:4], vec[4:5]
        g2, be2 = vec[5:6], vec[6:7]
        g3, be3 = vec[7:8], vec[8:9]

        # ---- multi-head self attention: all heads & all batch rows fused ----
        qkv = jnp.dot(x, sa_w_ref[l], preferred_element_type=jnp.float32) + sa_b_ref[l]
        q = qkv[:, :d_model]
        k = qkv[:, d_model:2 * d_model]
        v = qkv[:, 2 * d_model:]
        # block-diagonal head expansion of Q -> one matmul for every (head, row, key)
        q_bd = jnp.concatenate([q] * n_head, axis=0) * q_mask          # (H*BS, D)
        s = jax.lax.dot_general(q_bd, k, (((1,), (1,)), ((), ())),
                                preferred_element_type=jnp.float32) + bias
        m = jnp.max(s, axis=-1, keepdims=True)
        e = jnp.exp(s - m)
        p = e * pl.reciprocal(jnp.sum(e, axis=-1, keepdims=True), approx=True)
        oh = jnp.dot(p, v, preferred_element_type=jnp.float32) * hmask  # (H*BS, D)
        o_cat = oh[0:BS]                                                # concat(heads)
        for h in range(1, n_head):
            o_cat = o_cat + oh[h * BS:(h + 1) * BS]
        attn = jnp.dot(o_cat, sa_wo_ref[l], preferred_element_type=jnp.float32) + sa_bo
        x = _layernorm(x + attn, g1, be1)

        # ---- cross attention over the single memory token --------------------
        # softmax over one key == 1, so it is exactly z @ (W_v W_o) + b (pre-folded)
        ca = jnp.dot(z_rep, ca_w_ref[l], preferred_element_type=jnp.float32) + ca_b
        x = _layernorm(x + ca, g2, be2)

        # ---- feed-forward (dropout == identity: inference semantics) ---------
        h1 = _gelu(jnp.dot(x, w1_ref[l], preferred_element_type=jnp.float32) + b1_ref[l])
        h2 = jnp.dot(h1, w2_ref[l], preferred_element_type=jnp.float32) + b2
        x = _layernorm(x + h2, g3, be3)

    out = jnp.dot(x, wf_ref[...], preferred_element_type=jnp.float32) + bf_ref[...]
    o_ref[...] = out * omask_ref[...]        # final[~mask] = 0.0 (lane-dense store)


# --------------------------- parameter preparation ---------------------------
def prepare_weights(params, *, d_model, d_input):
    """One-time weight preprocessing (transposes, cross-attn folding, packing)."""
    p = params
    D = d_model
    d_pad = _round_up(d_input, 128)

    sa_wT = jnp.transpose(p['sa_w'], (0, 2, 1))                 # (L, D, 3D)
    sa_b = p['sa_b'][:, None, :]                                # (L, 1, 3D)
    sa_woT = jnp.transpose(p['sa_wo'], (0, 2, 1))               # (L, D, D)

    # cross-attention collapses (single memory token): fold W_v @ W_o once.
    ca_wvT = jnp.transpose(p['ca_w'][:, 2 * D:, :], (0, 2, 1))  # (L, D, D)
    ca_woT = jnp.transpose(p['ca_wo'], (0, 2, 1))               # (L, D, D)
    ca_w_comb = jnp.einsum('lde,lef->ldf', ca_wvT, ca_woT)      # (L, D, D)
    ca_b_comb = jnp.einsum('le,lef->lf', p['ca_b'][:, 2 * D:], ca_woT) + p['ca_bo']

    w1T = jnp.transpose(p['w1'], (0, 2, 1))                     # (L, D, d_inner)
    b1 = p['b1'][:, None, :]                                    # (L, 1, d_inner)
    w2T = jnp.transpose(p['w2'], (0, 2, 1))                     # (L, d_inner, D)

    # pack all per-layer (D,) vectors into one array -> one DMA instead of nine
    vecs = jnp.stack([p['sa_bo'], ca_b_comb, p['b2'],
                      p['g1'], p['be1'], p['g2'], p['be2'], p['g3'], p['be3']],
                     axis=1)                                    # (L, 9, D)

    wf_pad = jnp.zeros((D, d_pad), jnp.float32).at[:, :d_input].set(p['wf'].T)
    bf_pad = jnp.zeros((1, d_pad), jnp.float32).at[0, :d_input].set(p['bf'])
    return [sa_wT, sa_b, sa_woT, ca_w_comb, w1T, b1, w2T, vecs, wf_pad, bf_pad]


# --------------------------------- wrapper ----------------------------------
def motion_decoder_v1(z, lengths, prepared, *, d_model, n_head, n_layer, d_input):
    B = z.shape[0]
    S = int(max(lengths))
    BS = B * S
    d_pad = _round_up(d_input, 128)
    dh = d_model // n_head
    lengths_arr = jnp.asarray(lengths, jnp.int32)

    mask = jnp.arange(S)[None, :] < lengths_arr[:, None]               # (B, S) bool
    key_valid = mask.reshape(BS)
    batch_id = jnp.arange(BS) // S
    same_b = batch_id[:, None] == batch_id[None, :]
    attn_bias = jnp.where(same_b & key_valid[None, :], 0.0, -1e30).astype(jnp.float32)
    attn_bias_full = jnp.tile(attn_bias, (n_head, 1))                  # (H*BS, BS)

    row_head = jnp.repeat(jnp.arange(n_head), BS)
    col_head = jnp.arange(d_model) // dh
    head_mask = (row_head[:, None] == col_head[None, :]).astype(jnp.float32)  # (H*BS, D)

    out_mask = mask.reshape(BS, 1).astype(jnp.float32)
    x0 = jnp.tile(positional_encoding(S, d_model), (B, 1))             # tgt rows
    z_rep = jnp.repeat(z.reshape(B, d_model), S, axis=0)               # (BS, D)

    inputs = [x0, z_rep, attn_bias_full, head_mask, out_mask] + list(prepared)

    def full_spec(arr):
        nd = arr.ndim
        return pl.BlockSpec(arr.shape, lambda i, nd=nd: (0,) * nd)

    kernel = functools.partial(motion_decoder_kernel, n_layer=n_layer,
                               n_head=n_head, d_model=d_model)
    out_pad = pl.pallas_call(
        kernel,
        out_shape=jax.ShapeDtypeStruct((BS, d_pad), jnp.float32),
        grid=(1,),
        in_specs=[full_spec(a) for a in inputs],
        out_specs=pl.BlockSpec((BS, d_pad), lambda i: (0, 0)),
        compiler_params=pltpu.CompilerParams(dimension_semantics=("arbitrary",)),
    )(*inputs)
    return out_pad[:, :d_input].reshape(B, S, d_input)


# ----------------------- deterministic parameter init -----------------------
def init_params(key, d_input, d_model, d_inner, n_layer):
    ks = jax.random.split(key, 14)
    it = iter(ks)

    def nrm(shape, scale=0.05):
        return jax.random.normal(next(it), shape, jnp.float32) * scale

    p = {
        'sa_w': nrm((n_layer, 3 * d_model, d_model)), 'sa_b': nrm((n_layer, 3 * d_model)),
        'sa_wo': nrm((n_layer, d_model, d_model)), 'sa_bo': nrm((n_layer, d_model)),
        'ca_w': nrm((n_layer, 3 * d_model, d_model)), 'ca_b': nrm((n_layer, 3 * d_model)),
        'ca_wo': nrm((n_layer, d_model, d_model)), 'ca_bo': nrm((n_layer, d_model)),
        'w1': nrm((n_layer, d_inner, d_model)), 'b1': nrm((n_layer, d_inner)),
        'w2': nrm((n_layer, d_model, d_inner)), 'b2': nrm((n_layer, d_model)),
        'wf': nrm((d_input, d_model)), 'bf': nrm((d_input,)),
    }
    for i in (1, 2, 3):
        p[f'g{i}'] = jnp.ones((n_layer, d_model), jnp.float32)
        p[f'be{i}'] = jnp.zeros((n_layer, d_model), jnp.float32)
    return p


# ---------------------------- pure-JAX reference ----------------------------
def reference_forward(z, lengths, p, *, d_model, n_head, n_layer):
    hp = jax.lax.Precision.HIGHEST
    B = z.shape[0]
    S = int(max(lengths))
    dh = d_model // n_head
    lengths_arr = jnp.asarray(lengths)
    mask = jnp.arange(S)[None, :] < lengths_arr[:, None]
    kbias = (mask.astype(jnp.float32) - 1.0) * 1e30
    pe = positional_encoding(S, d_model)
    x = jnp.broadcast_to(pe[None], (B, S, d_model))
    mem = z

    def lin(a, w, b):
        return jnp.einsum('bsd,ed->bse', a, w, precision=hp) + b

    def ln(a, g, bb):
        mu = a.mean(-1, keepdims=True)
        ac = a - mu
        var = (ac * ac).mean(-1, keepdims=True)
        return ac / jnp.sqrt(var + 1e-5) * g + bb

    def mha(xq, xkv, w, b, wo, bo, use_kbias):
        D = d_model
        q = lin(xq, w[:D], b[:D])
        k = lin(xkv, w[D:2 * D], b[D:2 * D])
        v = lin(xkv, w[2 * D:], b[2 * D:])

        def split(t):
            return t.reshape(B, t.shape[1], n_head, dh).transpose(0, 2, 1, 3)

        qh, kh, vh = split(q), split(k), split(v)
        s = jnp.einsum('bhqd,bhkd->bhqk', qh, kh, precision=hp) / math.sqrt(dh)
        if use_kbias:
            s = s + kbias[:, None, None, :]
        pa = jax.nn.softmax(s, axis=-1)
        o = jnp.einsum('bhqk,bhkd->bhqd', pa, vh, precision=hp)
        o = o.transpose(0, 2, 1, 3).reshape(B, xq.shape[1], D)
        return lin(o, wo, bo)

    for l in range(n_layer):
        x = ln(x + mha(x, x, p['sa_w'][l], p['sa_b'][l], p['sa_wo'][l], p['sa_bo'][l], True),
               p['g1'][l], p['be1'][l])
        x = ln(x + mha(x, mem, p['ca_w'][l], p['ca_b'][l], p['ca_wo'][l], p['ca_bo'][l], False),
               p['g2'][l], p['be2'][l])
        h = _gelu(lin(x, p['w1'][l], p['b1'][l]))
        x = ln(x + lin(h, p['w2'][l], p['b2'][l]), p['g3'][l], p['be3'][l])

    out = lin(x, p['wf'], p['bf'])
    return out * mask.astype(jnp.float32)[..., None]


# ----------------------------------- main ------------------------------------
if __name__ == "__main__":
    B = 2
    D_INPUT, D_MODEL, D_INNER, N_HEAD, N_LAYER = 16, 32, 64, 4, 2
    lengths = [8, 5]                      # max length -> seq = 8

    key = jax.random.PRNGKey(0)
    kz, kp = jax.random.split(key)
    z = jax.random.normal(kz, (B, 1, D_MODEL), jnp.float32)
    params = init_params(kp, D_INPUT, D_MODEL, D_INNER, N_LAYER)

    # one-time parameter preprocessing, outside the per-call path
    prepared = prepare_weights(params, d_model=D_MODEL, d_input=D_INPUT)

    out = motion_decoder_v1(z, lengths, prepared, d_model=D_MODEL, n_head=N_HEAD,
                            n_layer=N_LAYER, d_input=D_INPUT)
    out = jax.block_until_ready(out)

    ref = reference_forward(z, lengths, params, d_model=D_MODEL, n_head=N_HEAD,
                            n_layer=N_LAYER)
    err = float(jnp.max(jnp.abs(out - ref)))
    assert out.shape == (B, max(lengths), D_INPUT)
    assert err < 1e-2, f"kernel/reference mismatch: {err}"
    print("KERNEL_OK")
</pallas_src>

<mosaic_0001>
module attributes {stable_mosaic.version = 11 : i64} {
  func.func @motion_decoder_kernel(%arg0: i32, %arg1: memref<16x32xf32, #tpu.memory_space<vmem>>, %arg2: memref<16x32xf32, #tpu.memory_space<vmem>>, %arg3: memref<64x16xf32, #tpu.memory_space<vmem>>, %arg4: memref<64x32xf32, #tpu.memory_space<vmem>>, %arg5: memref<16x1xf32, #tpu.memory_space<vmem>>, %arg6: memref<2x32x96xf32, #tpu.memory_space<vmem>>, %arg7: memref<2x1x96xf32, #tpu.memory_space<vmem>>, %arg8: memref<2x32x32xf32, #tpu.memory_space<vmem>>, %arg9: memref<2x32x32xf32, #tpu.memory_space<vmem>>, %arg10: memref<2x32x64xf32, #tpu.memory_space<vmem>>, %arg11: memref<2x1x64xf32, #tpu.memory_space<vmem>>, %arg12: memref<2x64x32xf32, #tpu.memory_space<vmem>>, %arg13: memref<2x9x32xf32, #tpu.memory_space<vmem>>, %arg14: memref<32x128xf32, #tpu.memory_space<vmem>>, %arg15: memref<1x128xf32, #tpu.memory_space<vmem>>, %arg16: memref<16x128xf32, #tpu.memory_space<vmem>>) attributes {dimension_semantics = [#tpu.dimension_semantics<arbitrary>], iteration_bounds = array<i64: 1>, scalar_prefetch = 0 : i64, scratch_operands = 0 : i64, tpu.core_type = #tpu.core_type<tc>, window_params = [{pipeline_mode = #tpu.pipeline_mode<synchronous>, transform_indices = @transform_0, window_bounds = array<i64: 16, 32>}, {pipeline_mode = #tpu.pipeline_mode<synchronous>, transform_indices = @transform_1, window_bounds = array<i64: 16, 32>}, {pipeline_mode = #tpu.pipeline_mode<synchronous>, transform_indices = @transform_2, window_bounds = array<i64: 64, 16>}, {pipeline_mode = #tpu.pipeline_mode<synchronous>, transform_indices = @transform_3, window_bounds = array<i64: 64, 32>}, {pipeline_mode = #tpu.pipeline_mode<synchronous>, transform_indices = @transform_4, window_bounds = array<i64: 16, 1>}, {pipeline_mode = #tpu.pipeline_mode<synchronous>, transform_indices = @transform_5, window_bounds = array<i64: 2, 32, 96>}, {pipeline_mode = #tpu.pipeline_mode<synchronous>, transform_indices = @transform_6, window_bounds = array<i64: 2, 1, 96>}, {pipeline_mode = #tpu.pipeline_mode<synchronous>, transform_indices = @transform_7, window_bounds = array<i64: 2, 32, 32>}, {pipeline_mode = #tpu.pipeline_mode<synchronous>, transform_indices = @transform_8, window_bounds = array<i64: 2, 32, 32>}, {pipeline_mode = #tpu.pipeline_mode<synchronous>, transform_indices = @transform_9, window_bounds = array<i64: 2, 32, 64>}, {pipeline_mode = #tpu.pipeline_mode<synchronous>, transform_indices = @transform_10, window_bounds = array<i64: 2, 1, 64>}, {pipeline_mode = #tpu.pipeline_mode<synchronous>, transform_indices = @transform_11, window_bounds = array<i64: 2, 64, 32>}, {pipeline_mode = #tpu.pipeline_mode<synchronous>, transform_indices = @transform_12, window_bounds = array<i64: 2, 9, 32>}, {pipeline_mode = #tpu.pipeline_mode<synchronous>, transform_indices = @transform_13, window_bounds = array<i64: 32, 128>}, {pipeline_mode = #tpu.pipeline_mode<synchronous>, transform_indices = @transform_14, window_bounds = array<i64: 1, 128>}, {pipeline_mode = #tpu.pipeline_mode<synchronous>, transform_indices = @transform_15, window_bounds = array<i64: 16, 128>}]} {
    %c0 = arith.constant 0 : index
    %c0_0 = arith.constant 0 : index
    %0 = vector.load %arg1[%c0, %c0_0] : memref<16x32xf32, #tpu.memory_space<vmem>>, vector<16x32xf32>
    %c0_1 = arith.constant 0 : index
    %c0_2 = arith.constant 0 : index
    %1 = vector.load %arg2[%c0_1, %c0_2] : memref<16x32xf32, #tpu.memory_space<vmem>>, vector<16x32xf32>
    %c0_3 = arith.constant 0 : index
    %c0_4 = arith.constant 0 : index
    %2 = vector.load %arg3[%c0_3, %c0_4] : memref<64x16xf32, #tpu.memory_space<vmem>>, vector<64x16xf32>
    %c0_5 = arith.constant 0 : index
    %c0_6 = arith.constant 0 : index
    %3 = vector.load %arg4[%c0_5, %c0_6] : memref<64x32xf32, #tpu.memory_space<vmem>>, vector<64x32xf32>
    %cst = arith.constant 0.353553385 : f32
    %4 = vector.broadcast %cst : f32 to vector<64x32xf32>
    %5 = arith.mulf %3, %4 : vector<64x32xf32>
    %c0_7 = arith.constant 0 : index
    %c0_8 = arith.constant 0 : index
    %c0_9 = arith.constant 0 : index
    %6 = vector.load %arg13[%c0_7, %c0_8, %c0_9] : memref<2x9x32xf32, #tpu.memory_space<vmem>>, vector<1x9x32xf32>
    %7 = vector.shape_cast %6 : vector<1x9x32xf32> to vector<9x32xf32>
    %8 = vector.extract_strided_slice %7 {offsets = [0, 0], sizes = [1, 32], strides = [1, 1]} : vector<9x32xf32> to vector<1x32xf32>
    %9 = vector.extract_strided_slice %7 {offsets = [1, 0], sizes = [1, 32], strides = [1, 1]} : vector<9x32xf32> to vector<1x32xf32>
    %10 = vector.extract_strided_slice %7 {offsets = [2, 0], sizes = [1, 32], strides = [1, 1]} : vector<9x32xf32> to vector<1x32xf32>
    %11 = vector.extract_strided_slice %7 {offsets = [3, 0], sizes = [1, 32], strides = [1, 1]} : vector<9x32xf32> to vector<1x32xf32>
    %12 = vector.extract_strided_slice %7 {offsets = [4, 0], sizes = [1, 32], strides = [1, 1]} : vector<9x32xf32> to vector<1x32xf32>
    %13 = vector.extract_strided_slice %7 {offsets = [5, 0], sizes = [1, 32], strides = [1, 1]} : vector<9x32xf32> to vector<1x32xf32>
    %14 = vector.extract_strided_slice %7 {offsets = [6, 0], sizes = [1, 32], strides = [1, 1]} : vector<9x32xf32> to vector<1x32xf32>
    %15 = vector.extract_strided_slice %7 {offsets = [7, 0], sizes = [1, 32], strides = [1, 1]} : vector<9x32xf32> to vector<1x32xf32>
    %16 = vector.extract_strided_slice %7 {offsets = [8, 0], sizes = [1, 32], strides = [1, 1]} : vector<9x32xf32> to vector<1x32xf32>
    %c0_10 = arith.constant 0 : index
    %c0_11 = arith.constant 0 : index
    %c0_12 = arith.constant 0 : index
    %17 = vector.load %arg6[%c0_10, %c0_11, %c0_12] : memref<2x32x96xf32, #tpu.memory_space<vmem>>, vector<1x32x96xf32>
    %18 = vector.shape_cast %17 : vector<1x32x96xf32> to vector<32x96xf32>
    %cst_13 = arith.constant dense<0.000000e+00> : vector<16x96xf32>
    %19 = tpu.matmul %0, %18, %cst_13 {dimension_numbers = #tpu.dot_dimension_numbers<[1], [0], [0], [1], [0, 0, 1, 1], [], []>} : vector<16x32xf32>, vector<32x96xf32>, vector<16x96xf32> -> vector<16x96xf32>
    %c0_14 = arith.constant 0 : index
    %c0_15 = arith.constant 0 : index
    %c0_16 = arith.constant 0 : index
    %20 = vector.load %arg7[%c0_14, %c0_15, %c0_16] : memref<2x1x96xf32, #tpu.memory_space<vmem>>, vector<1x1x96xf32>
    %21 = vector.shape_cast %20 : vector<1x1x96xf32> to vector<1x96xf32>
    %22 = vector.broadcast %21 : vector<1x96xf32> to vector<16x96xf32>
    %23 = arith.addf %19, %22 : vector<16x96xf32>
    %24 = vector.extract_strided_slice %23 {offsets = [0, 0], sizes = [16, 32], strides = [1, 1]} : vector<16x96xf32> to vector<16x32xf32>
    %25 = vector.extract_strided_slice %23 {offsets = [0, 32], sizes = [16, 32], strides = [1, 1]} : vector<16x96xf32> to vector<16x32xf32>
    %26 = vector.extract_strided_slice %23 {offsets = [0, 64], sizes = [16, 32], strides = [1, 1]} : vector<16x96xf32> to vector<16x32xf32>
    %27 = tpu.concatenate %24, %24, %24, %24 in 0 : vector<16x32xf32>, vector<16x32xf32>, vector<16x32xf32>, vector<16x32xf32> -> vector<64x32xf32>
    %28 = arith.mulf %27, %5 : vector<64x32xf32>
    %cst_17 = arith.constant dense<0.000000e+00> : vector<64x16xf32>
    %29 = tpu.matmul %28, %25, %cst_17 {dimension_numbers = #tpu.dot_dimension_numbers<[1], [1], [0], [0], [0, 0, 1, 0], [], []>} : vector<64x32xf32>, vector<16x32xf32>, vector<64x16xf32> -> vector<64x16xf32>
    %30 = arith.addf %29, %2 : vector<64x16xf32>
    %cst_18 = arith.constant dense<0xFF800000> : vector<64xf32>
    %31 = vector.multi_reduction <maximumf>, %30, %cst_18 [1] : vector<64x16xf32> to vector<64xf32>
    %32 = vector.shape_cast %31 : vector<64xf32> to vector<64x1xf32>
    %33 = vector.broadcast %32 : vector<64x1xf32> to vector<64x16xf32>
    %34 = arith.subf %30, %33 : vector<64x16xf32>
    %35 = math.exp %34 : vector<64x16xf32>
    %cst_19 = arith.constant dense<0.000000e+00> : vector<64xf32>
    %36 = vector.multi_reduction <add>, %35, %cst_19 [1] : vector<64x16xf32> to vector<64xf32>
    %37 = vector.shape_cast %36 : vector<64xf32> to vector<64x1xf32>
    %38 = tpu.reciprocal %37 {approx = true} : vector<64x1xf32> -> vector<64x1xf32>
    %39 = vector.broadcast %38 : vector<64x1xf32> to vector<64x16xf32>
    %40 = arith.mulf %35, %39 : vector<64x16xf32>
    %cst_20 = arith.constant dense<0.000000e+00> : vector<64x32xf32>
    %41 = tpu.matmul %40, %26, %cst_20 {dimension_numbers = #tpu.dot_dimension_numbers<[1], [0], [0], [1], [0, 0, 1, 1], [], []>} : vector<64x16xf32>, vector<16x32xf32>, vector<64x32xf32> -> vector<64x32xf32>
    %42 = arith.mulf %41, %3 : vector<64x32xf32>
    %43 = vector.extract_strided_slice %42 {offsets = [0, 0], sizes = [16, 32], strides = [1, 1]} : vector<64x32xf32> to vector<16x32xf32>
    %44 = vector.extract_strided_slice %42 {offsets = [16, 0], sizes = [16, 32], strides = [1, 1]} : vector<64x32xf32> to vector<16x32xf32>
    %45 = arith.addf %43, %44 : vector<16x32xf32>
    %46 = vector.extract_strided_slice %42 {offsets = [32, 0], sizes = [16, 32], strides = [1, 1]} : vector<64x32xf32> to vector<16x32xf32>
    %47 = arith.addf %45, %46 : vector<16x32xf32>
    %48 = vector.extract_strided_slice %42 {offsets = [48, 0], sizes = [16, 32], strides = [1, 1]} : vector<64x32xf32> to vector<16x32xf32>
    %49 = arith.addf %47, %48 : vector<16x32xf32>
    %c0_21 = arith.constant 0 : index
    %c0_22 = arith.constant 0 : index
    %c0_23 = arith.constant 0 : index
    %50 = vector.load %arg8[%c0_21, %c0_22, %c0_23] : memref<2x32x32xf32, #tpu.memory_space<vmem>>, vector<1x32x32xf32>
    %51 = vector.shape_cast %50 : vector<1x32x32xf32> to vector<32x32xf32>
    %cst_24 = arith.constant dense<0.000000e+00> : vector<16x32xf32>
    %52 = tpu.matmul %49, %51, %cst_24 {dimension_numbers = #tpu.dot_dimension_numbers<[1], [0], [0], [1], [0, 0, 1, 1], [], []>} : vector<16x32xf32>, vector<32x32xf32>, vector<16x32xf32> -> vector<16x32xf32>
    %53 = vector.broadcast %8 : vector<1x32xf32> to vector<16x32xf32>
    %54 = arith.addf %52, %53 : vector<16x32xf32>
    %55 = arith.addf %0, %54 : vector<16x32xf32>
    %cst_25 = arith.constant dense<0.000000e+00> : vector<16xf32>
    %56 = vector.multi_reduction <add>, %55, %cst_25 [1] : vector<16x32xf32> to vector<16xf32>
    %57 = vector.shape_cast %56 : vector<16xf32> to vector<16x1xf32>
    %cst_26 = arith.constant 3.200000e+01 : f32
    %58 = vector.broadcast %cst_26 : f32 to vector<16x1xf32>
    %59 = arith.divf %57, %58 : vector<16x1xf32>
    %60 = vector.broadcast %59 : vector<16x1xf32> to vector<16x32xf32>
    %61 = arith.subf %55, %60 : vector<16x32xf32>
    %62 = arith.mulf %61, %61 : vector<16x32xf32>
    %cst_27 = arith.constant dense<0.000000e+00> : vector<16xf32>
    %63 = vector.multi_reduction <add>, %62, %cst_27 [1] : vector<16x32xf32> to vector<16xf32>
    %64 = vector.shape_cast %63 : vector<16xf32> to vector<16x1xf32>
    %cst_28 = arith.constant 3.200000e+01 : f32
    %65 = vector.broadcast %cst_28 : f32 to vector<16x1xf32>
    %66 = arith.divf %64, %65 : vector<16x1xf32>
    %cst_29 = arith.constant 9.99999974E-6 : f32
    %67 = vector.broadcast %cst_29 : f32 to vector<16x1xf32>
    %68 = arith.addf %66, %67 : vector<16x1xf32>
    %69 = math.rsqrt %68 : vector<16x1xf32>
    %70 = vector.broadcast %69 : vector<16x1xf32> to vector<16x32xf32>
    %71 = arith.mulf %61, %70 : vector<16x32xf32>
    %72 = vector.broadcast %11 : vector<1x32xf32> to vector<16x32xf32>
    %73 = arith.mulf %71, %72 : vector<16x32xf32>
    %74 = vector.broadcast %12 : vector<1x32xf32> to vector<16x32xf32>
    %75 = arith.addf %73, %74 : vector<16x32xf32>
    %c0_30 = arith.constant 0 : index
    %c0_31 = arith.constant 0 : index
    %c0_32 = arith.constant 0 : index
    %76 = vector.load %arg9[%c0_30, %c0_31, %c0_32] : memref<2x32x32xf32, #tpu.memory_space<vmem>>, vector<1x32x32xf32>
    %77 = vector.shape_cast %76 : vector<1x32x32xf32> to vector<32x32xf32>
    %cst_33 = arith.constant dense<0.000000e+00> : vector<16x32xf32>
    %78 = tpu.matmul %1, %77, %cst_33 {dimension_numbers = #tpu.dot_dimension_numbers<[1], [0], [0], [1], [0, 0, 1, 1], [], []>} : vector<16x32xf32>, vector<32x32xf32>, vector<16x32xf32> -> vector<16x32xf32>
    %79 = vector.broadcast %9 : vector<1x32xf32> to vector<16x32xf32>
    %80 = arith.addf %78, %79 : vector<16x32xf32>
    %81 = arith.addf %75, %80 : vector<16x32xf32>
    %cst_34 = arith.constant dense<0.000000e+00> : vector<16xf32>
    %82 = vector.multi_reduction <add>, %81, %cst_34 [1] : vector<16x32xf32> to vector<16xf32>
    %83 = vector.shape_cast %82 : vector<16xf32> to vector<16x1xf32>
    %cst_35 = arith.constant 3.200000e+01 : f32
    %84 = vector.broadcast %cst_35 : f32 to vector<16x1xf32>
    %85 = arith.divf %83, %84 : vector<16x1xf32>
    %86 = vector.broadcast %85 : vector<16x1xf32> to vector<16x32xf32>
    %87 = arith.subf %81, %86 : vector<16x32xf32>
    %88 = arith.mulf %87, %87 : vector<16x32xf32>
    %cst_36 = arith.constant dense<0.000000e+00> : vector<16xf32>
    %89 = vector.multi_reduction <add>, %88, %cst_36 [1] : vector<16x32xf32> to vector<16xf32>
    %90 = vector.shape_cast %89 : vector<16xf32> to vector<16x1xf32>
    %cst_37 = arith.constant 3.200000e+01 : f32
    %91 = vector.broadcast %cst_37 : f32 to vector<16x1xf32>
    %92 = arith.divf %90, %91 : vector<16x1xf32>
    %cst_38 = arith.constant 9.99999974E-6 : f32
    %93 = vector.broadcast %cst_38 : f32 to vector<16x1xf32>
    %94 = arith.addf %92, %93 : vector<16x1xf32>
    %95 = math.rsqrt %94 : vector<16x1xf32>
    %96 = vector.broadcast %95 : vector<16x1xf32> to vector<16x32xf32>
    %97 = arith.mulf %87, %96 : vector<16x32xf32>
    %98 = vector.broadcast %13 : vector<1x32xf32> to vector<16x32xf32>
    %99 = arith.mulf %97, %98 : vector<16x32xf32>
    %100 = vector.broadcast %14 : vector<1x32xf32> to vector<16x32xf32>
    %101 = arith.addf %99, %100 : vector<16x32xf32>
    %c0_39 = arith.constant 0 : index
    %c0_40 = arith.constant 0 : index
    %c0_41 = arith.constant 0 : index
    %102 = vector.load %arg10[%c0_39, %c0_40, %c0_41] : memref<2x32x64xf32, #tpu.memory_space<vmem>>, vector<1x32x64xf32>
    %103 = vector.shape_cast %102 : vector<1x32x64xf32> to vector<32x64xf32>
    %cst_42 = arith.constant dense<0.000000e+00> : vector<16x64xf32>
    %104 = tpu.matmul %101, %103, %cst_42 {dimension_numbers = #tpu.dot_dimension_numbers<[1], [0], [0], [1], [0, 0, 1, 1], [], []>} : vector<16x32xf32>, vector<32x64xf32>, vector<16x64xf32> -> vector<16x64xf32>
    %c0_43 = arith.constant 0 : index
    %c0_44 = arith.constant 0 : index
    %c0_45 = arith.constant 0 : index
    %105 = vector.load %arg11[%c0_43, %c0_44, %c0_45] : memref<2x1x64xf32, #tpu.memory_space<vmem>>, vector<1x1x64xf32>
    %106 = vector.shape_cast %105 : vector<1x1x64xf32> to vector<1x64xf32>
    %107 = vector.broadcast %106 : vector<1x64xf32> to vector<16x64xf32>
    %108 = arith.addf %104, %107 : vector<16x64xf32>
    %cst_46 = arith.constant 5.000000e-01 : f32
    %109 = vector.broadcast %cst_46 : f32 to vector<16x64xf32>
    %110 = arith.mulf %109, %108 : vector<16x64xf32>
    %cst_47 = arith.constant 0.707106769 : f32
    %111 = vector.broadcast %cst_47 : f32 to vector<16x64xf32>
    %112 = arith.mulf %108, %111 : vector<16x64xf32>
    %cst_48 = arith.constant 0.000000e+00 : f32
    %113 = vector.broadcast %cst_48 : f32 to vector<16x64xf32>
    %114 = arith.cmpf oge, %112, %113 : vector<16x64xf32>
    %cst_49 = arith.constant 1.000000e+00 : f32
    %cst_50 = arith.constant -1.000000e+00 : f32
    %115 = vector.broadcast %cst_49 : f32 to vector<16x64xf32>
    %116 = vector.broadcast %cst_50 : f32 to vector<16x64xf32>
    %117 = arith.select %114, %115, %116 : vector<16x64xi1>, vector<16x64xf32>
    %118 = math.absf %112 : vector<16x64xf32>
    %cst_51 = arith.constant 0.327591091 : f32
    %119 = vector.broadcast %cst_51 : f32 to vector<16x64xf32>
    %120 = arith.mulf %119, %118 : vector<16x64xf32>
    %cst_52 = arith.constant 1.000000e+00 : f32
    %121 = vector.broadcast %cst_52 : f32 to vector<16x64xf32>
    %122 = arith.addf %121, %120 : vector<16x64xf32>
    %cst_53 = arith.constant 1.000000e+00 : f32
    %123 = vector.broadcast %cst_53 : f32 to vector<16x64xf32>
    %124 = arith.divf %123, %122 : vector<16x64xf32>
    %cst_54 = arith.constant 1.06140542 : f32
    %125 = vector.broadcast %cst_54 : f32 to vector<16x64xf32>
    %126 = arith.mulf %124, %125 : vector<16x64xf32>
    %cst_55 = arith.constant -1.45315206 : f32
    %127 = vector.broadcast %cst_55 : f32 to vector<16x64xf32>
    %128 = arith.addf %127, %126 : vector<16x64xf32>
    %129 = arith.mulf %124, %128 : vector<16x64xf32>
    %cst_56 = arith.constant 1.42141378 : f32
    %130 = vector.broadcast %cst_56 : f32 to vector<16x64xf32>
    %131 = arith.addf %130, %129 : vector<16x64xf32>
    %132 = arith.mulf %124, %131 : vector<16x64xf32>
    %cst_57 = arith.constant -0.284496725 : f32
    %133 = vector.broadcast %cst_57 : f32 to vector<16x64xf32>
    %134 = arith.addf %133, %132 : vector<16x64xf32>
    %135 = arith.mulf %124, %134 : vector<16x64xf32>
    %cst_58 = arith.constant 0.254829586 : f32
    %136 = vector.broadcast %cst_58 : f32 to vector<16x64xf32>
    %137 = arith.addf %136, %135 : vector<16x64xf32>
    %138 = arith.mulf %124, %137 : vector<16x64xf32>
    %cst_59 = arith.constant 0.000000e+00 : f32
    %139 = vector.broadcast %cst_59 : f32 to vector<16x64xf32>
    %140 = arith.subf %139, %118 : vector<16x64xf32>
    %141 = arith.mulf %140, %118 : vector<16x64xf32>
    %142 = math.exp %141 : vector<16x64xf32>
    %143 = arith.mulf %138, %142 : vector<16x64xf32>
    %cst_60 = arith.constant 1.000000e+00 : f32
    %144 = vector.broadcast %cst_60 : f32 to vector<16x64xf32>
    %145 = arith.subf %144, %143 : vector<16x64xf32>
    %146 = arith.mulf %117, %145 : vector<16x64xf32>
    %cst_61 = arith.constant 1.000000e+00 : f32
    %147 = vector.broadcast %cst_61 : f32 to vector<16x64xf32>
    %148 = arith.addf %147, %146 : vector<16x64xf32>
    %149 = arith.mulf %110, %148 : vector<16x64xf32>
    %c0_62 = arith.constant 0 : index
    %c0_63 = arith.constant 0 : index
    %c0_64 = arith.constant 0 : index
    %150 = vector.load %arg12[%c0_62, %c0_63, %c0_64] : memref<2x64x32xf32, #tpu.memory_space<vmem>>, vector<1x64x32xf32>
    %151 = vector.shape_cast %150 : vector<1x64x32xf32> to vector<64x32xf32>
    %cst_65 = arith.constant dense<0.000000e+00> : vector<16x32xf32>
    %152 = tpu.matmul %149, %151, %cst_65 {dimension_numbers = #tpu.dot_dimension_numbers<[1], [0], [0], [1], [0, 0, 1, 1], [], []>} : vector<16x64xf32>, vector<64x32xf32>, vector<16x32xf32> -> vector<16x32xf32>
    %153 = vector.broadcast %10 : vector<1x32xf32> to vector<16x32xf32>
    %154 = arith.addf %152, %153 : vector<16x32xf32>
    %155 = arith.addf %101, %154 : vector<16x32xf32>
    %cst_66 = arith.constant dense<0.000000e+00> : vector<16xf32>
    %156 = vector.multi_reduction <add>, %155, %cst_66 [1] : vector<16x32xf32> to vector<16xf32>
    %157 = vector.shape_cast %156 : vector<16xf32> to vector<16x1xf32>
    %cst_67 = arith.constant 3.200000e+01 : f32
    %158 = vector.broadcast %cst_67 : f32 to vector<16x1xf32>
    %159 = arith.divf %157, %158 : vector<16x1xf32>
    %160 = vector.broadcast %159 : vector<16x1xf32> to vector<16x32xf32>
    %161 = arith.subf %155, %160 : vector<16x32xf32>
    %162 = arith.mulf %161, %161 : vector<16x32xf32>
    %cst_68 = arith.constant dense<0.000000e+00> : vector<16xf32>
    %163 = vector.multi_reduction <add>, %162, %cst_68 [1] : vector<16x32xf32> to vector<16xf32>
    %164 = vector.shape_cast %163 : vector<16xf32> to vector<16x1xf32>
    %cst_69 = arith.constant 3.200000e+01 : f32
    %165 = vector.broadcast %cst_69 : f32 to vector<16x1xf32>
    %166 = arith.divf %164, %165 : vector<16x1xf32>
    %cst_70 = arith.constant 9.99999974E-6 : f32
    %167 = vector.broadcast %cst_70 : f32 to vector<16x1xf32>
    %168 = arith.addf %166, %167 : vector<16x1xf32>
    %169 = math.rsqrt %168 : vector<16x1xf32>
    %170 = vector.broadcast %169 : vector<16x1xf32> to vector<16x32xf32>
    %171 = arith.mulf %161, %170 : vector<16x32xf32>
    %172 = vector.broadcast %15 : vector<1x32xf32> to vector<16x32xf32>
    %173 = arith.mulf %171, %172 : vector<16x32xf32>
    %174 = vector.broadcast %16 : vector<1x32xf32> to vector<16x32xf32>
    %175 = arith.addf %173, %174 : vector<16x32xf32>
    %c1 = arith.constant 1 : index
    %c0_71 = arith.constant 0 : index
    %c0_72 = arith.constant 0 : index
    %176 = vector.load %arg13[%c1, %c0_71, %c0_72] : memref<2x9x32xf32, #tpu.memory_space<vmem>>, vector<1x9x32xf32>
    %177 = vector.shape_cast %176 : vector<1x9x32xf32> to vector<9x32xf32>
    %178 = vector.extract_strided_slice %177 {offsets = [0, 0], sizes = [1, 32], strides = [1, 1]} : vector<9x32xf32> to vector<1x32xf32>
    %179 = vector.extract_strided_slice %177 {offsets = [1, 0], sizes = [1, 32], strides = [1, 1]} : vector<9x32xf32> to vector<1x32xf32>
    %180 = vector.extract_strided_slice %177 {offsets = [2, 0], sizes = [1, 32], strides = [1, 1]} : vector<9x32xf32> to vector<1x32xf32>
    %181 = vector.extract_strided_slice %177 {offsets = [3, 0], sizes = [1, 32], strides = [1, 1]} : vector<9x32xf32> to vector<1x32xf32>
    %182 = vector.extract_strided_slice %177 {offsets = [4, 0], sizes = [1, 32], strides = [1, 1]} : vector<9x32xf32> to vector<1x32xf32>
    %183 = vector.extract_strided_slice %177 {offsets = [5, 0], sizes = [1, 32], strides = [1, 1]} : vector<9x32xf32> to vector<1x32xf32>
    %184 = vector.extract_strided_slice %177 {offsets = [6, 0], sizes = [1, 32], strides = [1, 1]} : vector<9x32xf32> to vector<1x32xf32>
    %185 = vector.extract_strided_slice %177 {offsets = [7, 0], sizes = [1, 32], strides = [1, 1]} : vector<9x32xf32> to vector<1x32xf32>
    %186 = vector.extract_strided_slice %177 {offsets = [8, 0], sizes = [1, 32], strides = [1, 1]} : vector<9x32xf32> to vector<1x32xf32>
    %c1_73 = arith.constant 1 : index
    %c0_74 = arith.constant 0 : index
    %c0_75 = arith.constant 0 : index
    %187 = vector.load %arg6[%c1_73, %c0_74, %c0_75] : memref<2x32x96xf32, #tpu.memory_space<vmem>>, vector<1x32x96xf32>
    %188 = vector.shape_cast %187 : vector<1x32x96xf32> to vector<32x96xf32>
    %cst_76 = arith.constant dense<0.000000e+00> : vector<16x96xf32>
    %189 = tpu.matmul %175, %188, %cst_76 {dimension_numbers = #tpu.dot_dimension_numbers<[1], [0], [0], [1], [0, 0, 1, 1], [], []>} : vector<16x32xf32>, vector<32x96xf32>, vector<16x96xf32> -> vector<16x96xf32>
    %c1_77 = arith.constant 1 : index
    %c0_78 = arith.constant 0 : index
    %c0_79 = arith.constant 0 : index
    %190 = vector.load %arg7[%c1_77, %c0_78, %c0_79] : memref<2x1x96xf32, #tpu.memory_space<vmem>>, vector<1x1x96xf32>
    %191 = vector.shape_cast %190 : vector<1x1x96xf32> to vector<1x96xf32>
    %192 = vector.broadcast %191 : vector<1x96xf32> to vector<16x96xf32>
    %193 = arith.addf %189, %192 : vector<16x96xf32>
    %194 = vector.extract_strided_slice %193 {offsets = [0, 0], sizes = [16, 32], strides = [1, 1]} : vector<16x96xf32> to vector<16x32xf32>
    %195 = vector.extract_strided_slice %193 {offsets = [0, 32], sizes = [16, 32], strides = [1, 1]} : vector<16x96xf32> to vector<16x32xf32>
    %196 = vector.extract_strided_slice %193 {offsets = [0, 64], sizes = [16, 32], strides = [1, 1]} : vector<16x96xf32> to vector<16x32xf32>
    %197 = tpu.concatenate %194, %194, %194, %194 in 0 : vector<16x32xf32>, vector<16x32xf32>, vector<16x32xf32>, vector<16x32xf32> -> vector<64x32xf32>
    %198 = arith.mulf %197, %5 : vector<64x32xf32>
    %cst_80 = arith.constant dense<0.000000e+00> : vector<64x16xf32>
    %199 = tpu.matmul %198, %195, %cst_80 {dimension_numbers = #tpu.dot_dimension_numbers<[1], [1], [0], [0], [0, 0, 1, 0], [], []>} : vector<64x32xf32>, vector<16x32xf32>, vector<64x16xf32> -> vector<64x16xf32>
    %200 = arith.addf %199, %2 : vector<64x16xf32>
    %cst_81 = arith.constant dense<0xFF800000> : vector<64xf32>
    %201 = vector.multi_reduction <maximumf>, %200, %cst_81 [1] : vector<64x16xf32> to vector<64xf32>
    %202 = vector.shape_cast %201 : vector<64xf32> to vector<64x1xf32>
    %203 = vector.broadcast %202 : vector<64x1xf32> to vector<64x16xf32>
    %204 = arith.subf %200, %203 : vector<64x16xf32>
    %205 = math.exp %204 : vector<64x16xf32>
    %cst_82 = arith.constant dense<0.000000e+00> : vector<64xf32>
    %206 = vector.multi_reduction <add>, %205, %cst_82 [1] : vector<64x16xf32> to vector<64xf32>
    %207 = vector.shape_cast %206 : vector<64xf32> to vector<64x1xf32>
    %208 = tpu.reciprocal %207 {approx = true} : vector<64x1xf32> -> vector<64x1xf32>
    %209 = vector.broadcast %208 : vector<64x1xf32> to vector<64x16xf32>
    %210 = arith.mulf %205, %209 : vector<64x16xf32>
    %cst_83 = arith.constant dense<0.000000e+00> : vector<64x32xf32>
    %211 = tpu.matmul %210, %196, %cst_83 {dimension_numbers = #tpu.dot_dimension_numbers<[1], [0], [0], [1], [0, 0, 1, 1], [], []>} : vector<64x16xf32>, vector<16x32xf32>, vector<64x32xf32> -> vector<64x32xf32>
    %212 = arith.mulf %211, %3 : vector<64x32xf32>
    %213 = vector.extract_strided_slice %212 {offsets = [0, 0], sizes = [16, 32], strides = [1, 1]} : vector<64x32xf32> to vector<16x32xf32>
    %214 = vector.extract_strided_slice %212 {offsets = [16, 0], sizes = [16, 32], strides = [1, 1]} : vector<64x32xf32> to vector<16x32xf32>
    %215 = arith.addf %213, %214 : vector<16x32xf32>
    %216 = vector.extract_strided_slice %212 {offsets = [32, 0], sizes = [16, 32], strides = [1, 1]} : vector<64x32xf32> to vector<16x32xf32>
    %217 = arith.addf %215, %216 : vector<16x32xf32>
    %218 = vector.extract_strided_slice %212 {offsets = [48, 0], sizes = [16, 32], strides = [1, 1]} : vector<64x32xf32> to vector<16x32xf32>
    %219 = arith.addf %217, %218 : vector<16x32xf32>
    %c1_84 = arith.constant 1 : index
    %c0_85 = arith.constant 0 : index
    %c0_86 = arith.constant 0 : index
    %220 = vector.load %arg8[%c1_84, %c0_85, %c0_86] : memref<2x32x32xf32, #tpu.memory_space<vmem>>, vector<1x32x32xf32>
    %221 = vector.shape_cast %220 : vector<1x32x32xf32> to vector<32x32xf32>
    %cst_87 = arith.constant dense<0.000000e+00> : vector<16x32xf32>
    %222 = tpu.matmul %219, %221, %cst_87 {dimension_numbers = #tpu.dot_dimension_numbers<[1], [0], [0], [1], [0, 0, 1, 1], [], []>} : vector<16x32xf32>, vector<32x32xf32>, vector<16x32xf32> -> vector<16x32xf32>
    %223 = vector.broadcast %178 : vector<1x32xf32> to vector<16x32xf32>
    %224 = arith.addf %222, %223 : vector<16x32xf32>
    %225 = arith.addf %175, %224 : vector<16x32xf32>
    %cst_88 = arith.constant dense<0.000000e+00> : vector<16xf32>
    %226 = vector.multi_reduction <add>, %225, %cst_88 [1] : vector<16x32xf32> to vector<16xf32>
    %227 = vector.shape_cast %226 : vector<16xf32> to vector<16x1xf32>
    %cst_89 = arith.constant 3.200000e+01 : f32
    %228 = vector.broadcast %cst_89 : f32 to vector<16x1xf32>
    %229 = arith.divf %227, %228 : vector<16x1xf32>
    %230 = vector.broadcast %229 : vector<16x1xf32> to vector<16x32xf32>
    %231 = arith.subf %225, %230 : vector<16x32xf32>
    %232 = arith.mulf %231, %231 : vector<16x32xf32>
    %cst_90 = arith.constant dense<0.000000e+00> : vector<16xf32>
    %233 = vector.multi_reduction <add>, %232, %cst_90 [1] : vector<16x32xf32> to vector<16xf32>
    %234 = vector.shape_cast %233 : vector<16xf32> to vector<16x1xf32>
    %cst_91 = arith.constant 3.200000e+01 : f32
    %235 = vector.broadcast %cst_91 : f32 to vector<16x1xf32>
    %236 = arith.divf %234, %235 : vector<16x1xf32>
    %cst_92 = arith.constant 9.99999974E-6 : f32
    %237 = vector.broadcast %cst_92 : f32 to vector<16x1xf32>
    %238 = arith.addf %236, %237 : vector<16x1xf32>
    %239 = math.rsqrt %238 : vector<16x1xf32>
    %240 = vector.broadcast %239 : vector<16x1xf32> to vector<16x32xf32>
    %241 = arith.mulf %231, %240 : vector<16x32xf32>
    %242 = vector.broadcast %181 : vector<1x32xf32> to vector<16x32xf32>
    %243 = arith.mulf %241, %242 : vector<16x32xf32>
    %244 = vector.broadcast %182 : vector<1x32xf32> to vector<16x32xf32>
    %245 = arith.addf %243, %244 : vector<16x32xf32>
    %c1_93 = arith.constant 1 : index
    %c0_94 = arith.constant 0 : index
    %c0_95 = arith.constant 0 : index
    %246 = vector.load %arg9[%c1_93, %c0_94, %c0_95] : memref<2x32x32xf32, #tpu.memory_space<vmem>>, vector<1x32x32xf32>
    %247 = vector.shape_cast %246 : vector<1x32x32xf32> to vector<32x32xf32>
    %cst_96 = arith.constant dense<0.000000e+00> : vector<16x32xf32>
    %248 = tpu.matmul %1, %247, %cst_96 {dimension_numbers = #tpu.dot_dimension_numbers<[1], [0], [0], [1], [0, 0, 1, 1], [], []>} : vector<16x32xf32>, vector<32x32xf32>, vector<16x32xf32> -> vector<16x32xf32>
    %249 = vector.broadcast %179 : vector<1x32xf32> to vector<16x32xf32>
    %250 = arith.addf %248, %249 : vector<16x32xf32>
    %251 = arith.addf %245, %250 : vector<16x32xf32>
    %cst_97 = arith.constant dense<0.000000e+00> : vector<16xf32>
    %252 = vector.multi_reduction <add>, %251, %cst_97 [1] : vector<16x32xf32> to vector<16xf32>
    %253 = vector.shape_cast %252 : vector<16xf32> to vector<16x1xf32>
    %cst_98 = arith.constant 3.200000e+01 : f32
    %254 = vector.broadcast %cst_98 : f32 to vector<16x1xf32>
    %255 = arith.divf %253, %254 : vector<16x1xf32>
    %256 = vector.broadcast %255 : vector<16x1xf32> to vector<16x32xf32>
    %257 = arith.subf %251, %256 : vector<16x32xf32>
    %258 = arith.mulf %257, %257 : vector<16x32xf32>
    %cst_99 = arith.constant dense<0.000000e+00> : vector<16xf32>
    %259 = vector.multi_reduction <add>, %258, %cst_99 [1] : vector<16x32xf32> to vector<16xf32>
    %260 = vector.shape_cast %259 : vector<16xf32> to vector<16x1xf32>
    %cst_100 = arith.constant 3.200000e+01 : f32
    %261 = vector.broadcast %cst_100 : f32 to vector<16x1xf32>
    %262 = arith.divf %260, %261 : vector<16x1xf32>
    %cst_101 = arith.constant 9.99999974E-6 : f32
    %263 = vector.broadcast %cst_101 : f32 to vector<16x1xf32>
    %264 = arith.addf %262, %263 : vector<16x1xf32>
    %265 = math.rsqrt %264 : vector<16x1xf32>
    %266 = vector.broadcast %265 : vector<16x1xf32> to vector<16x32xf32>
    %267 = arith.mulf %257, %266 : vector<16x32xf32>
    %268 = vector.broadcast %183 : vector<1x32xf32> to vector<16x32xf32>
    %269 = arith.mulf %267, %268 : vector<16x32xf32>
    %270 = vector.broadcast %184 : vector<1x32xf32> to vector<16x32xf32>
    %271 = arith.addf %269, %270 : vector<16x32xf32>
    %c1_102 = arith.constant 1 : index
    %c0_103 = arith.constant 0 : index
    %c0_104 = arith.constant 0 : index
    %272 = vector.load %arg10[%c1_102, %c0_103, %c0_104] : memref<2x32x64xf32, #tpu.memory_space<vmem>>, vector<1x32x64xf32>
    %273 = vector.shape_cast %272 : vector<1x32x64xf32> to vector<32x64xf32>
    %cst_105 = arith.constant dense<0.000000e+00> : vector<16x64xf32>
    %274 = tpu.matmul %271, %273, %cst_105 {dimension_numbers = #tpu.dot_dimension_numbers<[1], [0], [0], [1], [0, 0, 1, 1], [], []>} : vector<16x32xf32>, vector<32x64xf32>, vector<16x64xf32> -> vector<16x64xf32>
    %c1_106 = arith.constant 1 : index
    %c0_107 = arith.constant 0 : index
    %c0_108 = arith.constant 0 : index
    %275 = vector.load %arg11[%c1_106, %c0_107, %c0_108] : memref<2x1x64xf32, #tpu.memory_space<vmem>>, vector<1x1x64xf32>
    %276 = vector.shape_cast %275 : vector<1x1x64xf32> to vector<1x64xf32>
    %277 = vector.broadcast %276 : vector<1x64xf32> to vector<16x64xf32>
    %278 = arith.addf %274, %277 : vector<16x64xf32>
    %cst_109 = arith.constant 5.000000e-01 : f32
    %279 = vector.broadcast %cst_109 : f32 to vector<16x64xf32>
    %280 = arith.mulf %279, %278 : vector<16x64xf32>
    %cst_110 = arith.constant 0.707106769 : f32
    %281 = vector.broadcast %cst_110 : f32 to vector<16x64xf32>
    %282 = arith.mulf %278, %281 : vector<16x64xf32>
    %cst_111 = arith.constant 0.000000e+00 : f32
    %283 = vector.broadcast %cst_111 : f32 to vector<16x64xf32>
    %284 = arith.cmpf oge, %282, %283 : vector<16x64xf32>
    %cst_112 = arith.constant 1.000000e+00 : f32
    %cst_113 = arith.constant -1.000000e+00 : f32
    %285 = vector.broadcast %cst_112 : f32 to vector<16x64xf32>
    %286 = vector.broadcast %cst_113 : f32 to vector<16x64xf32>
    %287 = arith.select %284, %285, %286 : vector<16x64xi1>, vector<16x64xf32>
    %288 = math.absf %282 : vector<16x64xf32>
    %cst_114 = arith.constant 0.327591091 : f32
    %289 = vector.broadcast %cst_114 : f32 to vector<16x64xf32>
    %290 = arith.mulf %289, %288 : vector<16x64xf32>
    %cst_115 = arith.constant 1.000000e+00 : f32
    %291 = vector.broadcast %cst_115 : f32 to vector<16x64xf32>
    %292 = arith.addf %291, %290 : vector<16x64xf32>
    %cst_116 = arith.constant 1.000000e+00 : f32
    %293 = vector.broadcast %cst_116 : f32 to vector<16x64xf32>
    %294 = arith.divf %293, %292 : vector<16x64xf32>
    %cst_117 = arith.constant 1.06140542 : f32
    %295 = vector.broadcast %cst_117 : f32 to vector<16x64xf32>
    %296 = arith.mulf %294, %295 : vector<16x64xf32>
    %cst_118 = arith.constant -1.45315206 : f32
    %297 = vector.broadcast %cst_118 : f32 to vector<16x64xf32>
    %298 = arith.addf %297, %296 : vector<16x64xf32>
    %299 = arith.mulf %294, %298 : vector<16x64xf32>
    %cst_119 = arith.constant 1.42141378 : f32
    %300 = vector.broadcast %cst_119 : f32 to vector<16x64xf32>
    %301 = arith.addf %300, %299 : vector<16x64xf32>
    %302 = arith.mulf %294, %301 : vector<16x64xf32>
    %cst_120 = arith.constant -0.284496725 : f32
    %303 = vector.broadcast %cst_120 : f32 to vector<16x64xf32>
    %304 = arith.addf %303, %302 : vector<16x64xf32>
    %305 = arith.mulf %294, %304 : vector<16x64xf32>
    %cst_121 = arith.constant 0.254829586 : f32
    %306 = vector.broadcast %cst_121 : f32 to vector<16x64xf32>
    %307 = arith.addf %306, %305 : vector<16x64xf32>
    %308 = arith.mulf %294, %307 : vector<16x64xf32>
    %cst_122 = arith.constant 0.000000e+00 : f32
    %309 = vector.broadcast %cst_122 : f32 to vector<16x64xf32>
    %310 = arith.subf %309, %288 : vector<16x64xf32>
    %311 = arith.mulf %310, %288 : vector<16x64xf32>
    %312 = math.exp %311 : vector<16x64xf32>
    %313 = arith.mulf %308, %312 : vector<16x64xf32>
    %cst_123 = arith.constant 1.000000e+00 : f32
    %314 = vector.broadcast %cst_123 : f32 to vector<16x64xf32>
    %315 = arith.subf %314, %313 : vector<16x64xf32>
    %316 = arith.mulf %287, %315 : vector<16x64xf32>
    %cst_124 = arith.constant 1.000000e+00 : f32
    %317 = vector.broadcast %cst_124 : f32 to vector<16x64xf32>
    %318 = arith.addf %317, %316 : vector<16x64xf32>
    %319 = arith.mulf %280, %318 : vector<16x64xf32>
    %c1_125 = arith.constant 1 : index
    %c0_126 = arith.constant 0 : index
    %c0_127 = arith.constant 0 : index
    %320 = vector.load %arg12[%c1_125, %c0_126, %c0_127] : memref<2x64x32xf32, #tpu.memory_space<vmem>>, vector<1x64x32xf32>
    %321 = vector.shape_cast %320 : vector<1x64x32xf32> to vector<64x32xf32>
    %cst_128 = arith.constant dense<0.000000e+00> : vector<16x32xf32>
    %322 = tpu.matmul %319, %321, %cst_128 {dimension_numbers = #tpu.dot_dimension_numbers<[1], [0], [0], [1], [0, 0, 1, 1], [], []>} : vector<16x64xf32>, vector<64x32xf32>, vector<16x32xf32> -> vector<16x32xf32>
    %323 = vector.broadcast %180 : vector<1x32xf32> to vector<16x32xf32>
    %324 = arith.addf %322, %323 : vector<16x32xf32>
    %325 = arith.addf %271, %324 : vector<16x32xf32>
    %cst_129 = arith.constant dense<0.000000e+00> : vector<16xf32>
    %326 = vector.multi_reduction <add>, %325, %cst_129 [1] : vector<16x32xf32> to vector<16xf32>
    %327 = vector.shape_cast %326 : vector<16xf32> to vector<16x1xf32>
    %cst_130 = arith.constant 3.200000e+01 : f32
    %328 = vector.broadcast %cst_130 : f32 to vector<16x1xf32>
    %329 = arith.divf %327, %328 : vector<16x1xf32>
    %330 = vector.broadcast %329 : vector<16x1xf32> to vector<16x32xf32>
    %331 = arith.subf %325, %330 : vector<16x32xf32>
    %332 = arith.mulf %331, %331 : vector<16x32xf32>
    %cst_131 = arith.constant dense<0.000000e+00> : vector<16xf32>
    %333 = vector.multi_reduction <add>, %332, %cst_131 [1] : vector<16x32xf32> to vector<16xf32>
    %334 = vector.shape_cast %333 : vector<16xf32> to vector<16x1xf32>
    %cst_132 = arith.constant 3.200000e+01 : f32
    %335 = vector.broadcast %cst_132 : f32 to vector<16x1xf32>
    %336 = arith.divf %334, %335 : vector<16x1xf32>
    %cst_133 = arith.constant 9.99999974E-6 : f32
    %337 = vector.broadcast %cst_133 : f32 to vector<16x1xf32>
    %338 = arith.addf %336, %337 : vector<16x1xf32>
    %339 = math.rsqrt %338 : vector<16x1xf32>
    %340 = vector.broadcast %339 : vector<16x1xf32> to vector<16x32xf32>
    %341 = arith.mulf %331, %340 : vector<16x32xf32>
    %342 = vector.broadcast %185 : vector<1x32xf32> to vector<16x32xf32>
    %343 = arith.mulf %341, %342 : vector<16x32xf32>
    %344 = vector.broadcast %186 : vector<1x32xf32> to vector<16x32xf32>
    %345 = arith.addf %343, %344 : vector<16x32xf32>
    %c0_134 = arith.constant 0 : index
    %c0_135 = arith.constant 0 : index
    %346 = vector.load %arg14[%c0_134, %c0_135] : memref<32x128xf32, #tpu.memory_space<vmem>>, vector<32x128xf32>
    %cst_136 = arith.constant dense<0.000000e+00> : vector<16x128xf32>
    %347 = tpu.matmul %345, %346, %cst_136 {dimension_numbers = #tpu.dot_dimension_numbers<[1], [0], [0], [1], [0, 0, 1, 1], [], []>} : vector<16x32xf32>, vector<32x128xf32>, vector<16x128xf32> -> vector<16x128xf32>
    %c0_137 = arith.constant 0 : index
    %c0_138 = arith.constant 0 : index
    %348 = vector.load %arg15[%c0_137, %c0_138] : memref<1x128xf32, #tpu.memory_space<vmem>>, vector<1x128xf32>
    %349 = vector.broadcast %348 : vector<1x128xf32> to vector<16x128xf32>
    %350 = arith.addf %347, %349 : vector<16x128xf32>
    %c0_139 = arith.constant 0 : index
    %c0_140 = arith.constant 0 : index
    %351 = vector.load %arg5[%c0_139, %c0_140] : memref<16x1xf32, #tpu.memory_space<vmem>>, vector<16x1xf32>
    %352 = vector.broadcast %351 : vector<16x1xf32> to vector<16x128xf32>
    %353 = arith.mulf %350, %352 : vector<16x128xf32>
    %c0_141 = arith.constant 0 : index
    %c0_142 = arith.constant 0 : index
    %354 = vector.load %arg16[%c0_141, %c0_142] : memref<16x128xf32, #tpu.memory_space<vmem>>, vector<16x128xf32>
    tpu.vector_store %arg16[%c0_141, %c0_142], %353 {strides = array<i32>} : memref<16x128xf32, #tpu.memory_space<vmem>>, vector<16x128xf32>,
    return
  }
  func.func @transform_0(%arg0: i32) -> (i32, i32) {
    %c0_i32 = arith.constant 0 : i32
    %c0_i32_0 = arith.constant 0 : i32
    %c0_i32_1 = arith.constant 0 : i32
    return %c0_i32, %c0_i32_0 : i32, i32
  }
  func.func @transform_1(%arg0: i32) -> (i32, i32) {
    %c0_i32 = arith.constant 0 : i32
    %c0_i32_0 = arith.constant 0 : i32
    %c0_i32_1 = arith.constant 0 : i32
    return %c0_i32, %c0_i32_0 : i32, i32
  }
  func.func @transform_2(%arg0: i32) -> (i32, i32) {
    %c0_i32 = arith.constant 0 : i32
    %c0_i32_0 = arith.constant 0 : i32
    %c0_i32_1 = arith.constant 0 : i32
    return %c0_i32, %c0_i32_0 : i32, i32
  }
  func.func @transform_3(%arg0: i32) -> (i32, i32) {
    %c0_i32 = arith.constant 0 : i32
    %c0_i32_0 = arith.constant 0 : i32
    %c0_i32_1 = arith.constant 0 : i32
    return %c0_i32, %c0_i32_0 : i32, i32
  }
  func.func @transform_4(%arg0: i32) -> (i32, i32) {
    %c0_i32 = arith.constant 0 : i32
    %c0_i32_0 = arith.constant 0 : i32
    %c0_i32_1 = arith.constant 0 : i32
    return %c0_i32, %c0_i32_0 : i32, i32
  }
  func.func @transform_5(%arg0: i32) -> (i32, i32, i32) {
    %c0_i32 = arith.constant 0 : i32
    %c0_i32_0 = arith.constant 0 : i32
    %c0_i32_1 = arith.constant 0 : i32
    %c0_i32_2 = arith.constant 0 : i32
    return %c0_i32, %c0_i32_0, %c0_i32_1 : i32, i32, i32
  }
  func.func @transform_6(%arg0: i32) -> (i32, i32, i32) {
    %c0_i32 = arith.constant 0 : i32
    %c0_i32_0 = arith.constant 0 : i32
    %c0_i32_1 = arith.constant 0 : i32
    %c0_i32_2 = arith.constant 0 : i32
    return %c0_i32, %c0_i32_0, %c0_i32_1 : i32, i32, i32
  }
  func.func @transform_7(%arg0: i32) -> (i32, i32, i32) {
    %c0_i32 = arith.constant 0 : i32
    %c0_i32_0 = arith.constant 0 : i32
    %c0_i32_1 = arith.constant 0 : i32
    %c0_i32_2 = arith.constant 0 : i32
    return %c0_i32, %c0_i32_0, %c0_i32_1 : i32, i32, i32
  }
  func.func @transform_8(%arg0: i32) -> (i32, i32, i32) {
    %c0_i32 = arith.constant 0 : i32
    %c0_i32_0 = arith.constant 0 : i32
    %c0_i32_1 = arith.constant 0 : i32
    %c0_i32_2 = arith.constant 0 : i32
    return %c0_i32, %c0_i32_0, %c0_i32_1 : i32, i32, i32
  }
  func.func @transform_9(%arg0: i32) -> (i32, i32, i32) {
    %c0_i32 = arith.constant 0 : i32
    %c0_i32_0 = arith.constant 0 : i32
    %c0_i32_1 = arith.constant 0 : i32
    %c0_i32_2 = arith.constant 0 : i32
    return %c0_i32, %c0_i32_0, %c0_i32_1 : i32, i32, i32
  }
  func.func @transform_10(%arg0: i32) -> (i32, i32, i32) {
    %c0_i32 = arith.constant 0 : i32
    %c0_i32_0 = arith.constant 0 : i32
    %c0_i32_1 = arith.constant 0 : i32
    %c0_i32_2 = arith.constant 0 : i32
    return %c0_i32, %c0_i32_0, %c0_i32_1 : i32, i32, i32
  }
  func.func @transform_11(%arg0: i32) -> (i32, i32, i32) {
    %c0_i32 = arith.constant 0 : i32
    %c0_i32_0 = arith.constant 0 : i32
    %c0_i32_1 = arith.constant 0 : i32
    %c0_i32_2 = arith.constant 0 : i32
    return %c0_i32, %c0_i32_0, %c0_i32_1 : i32, i32, i32
  }
  func.func @transform_12(%arg0: i32) -> (i32, i32, i32) {
    %c0_i32 = arith.constant 0 : i32
    %c0_i32_0 = arith.constant 0 : i32
    %c0_i32_1 = arith.constant 0 : i32
    %c0_i32_2 = arith.constant 0 : i32
    return %c0_i32, %c0_i32_0, %c0_i32_1 : i32, i32, i32
  }
  func.func @transform_13(%arg0: i32) -> (i32, i32) {
    %c0_i32 = arith.constant 0 : i32
    %c0_i32_0 = arith.constant 0 : i32
    %c0_i32_1 = arith.constant 0 : i32
    return %c0_i32, %c0_i32_0 : i32, i32
  }
  func.func @transform_14(%arg0: i32) -> (i32, i32) {
    %c0_i32 = arith.constant 0 : i32
    %c0_i32_0 = arith.constant 0 : i32
    %c0_i32_1 = arith.constant 0 : i32
    return %c0_i32, %c0_i32_0 : i32, i32
  }
  func.func @transform_15(%arg0: i32) -> (i32, i32) {
    %c0_i32 = arith.constant 0 : i32
    %c0_i32_0 = arith.constant 0 : i32
    %c0_i32_1 = arith.constant 0 : i32
    return %c0_i32, %c0_i32_0 : i32, i32
  }
}

</mosaic_0001>

<bundles_post_ra>
// kernel: tpu_custom_call.1
= control target key start
LH: loop header
LB: loop body
LE: loop exit
PB: predicated region body
PF: predicated region fallthrough
CT: control target
= control target key end

     0   :  { %20 = vsyncpa [#allocation3], 0  ;;  %s3556_s0 = inlined_call_operand.vmem [shape: f32[16,32], index: 0, kind: input, shape index: {}]   ;;  %s3557_s1 = inlined_call_operand.vmem [shape: f32[16,32], index: 1, kind: input, shape index: {}]   ;;  %s3558_s2 = inlined_call_operand.vmem [shape: f32[64,16], index: 2, kind: input, shape index: {}]   ;;  %s3559_s3 = inlined_call_operand.vmem [shape: f32[64,32], index: 3, kind: input, shape index: {}]   ;;  %s3560_s4 = inlined_call_operand.vmem [shape: f32[16,1], index: 4, kind: input, shape index: {}]   ;;  %s3561_s5 = inlined_call_operand.vmem [shape: f32[2,32,96], index: 5, kind: input, shape index: {}]   ;;  %s3562_s6 = inlined_call_operand.vmem [shape: f32[2,1,96], index: 6, kind: input, shape index: {}]   ;;  %s3563_s7 = inlined_call_operand.vmem [shape: f32[2,32,32], index: 7, kind: input, shape index: {}]   ;;  %s3564_s8 = inlined_call_operand.vmem [shape: f32[2,32,32], index: 8, kind: input, shape index: {}]   ;;  %s3565_s9 = inlined_call_operand.vmem [shape: f32[2,32,64], index: 9, kind: input, shape index: {}]   ;;  %s3566_s10 = inlined_call_operand.hbm [shape: f32[2,1,64], index: 10, kind: input, shape index: {}]   ;;  %s3567_s11 = inlined_call_operand.vmem [shape: f32[2,64,32], index: 11, kind: input, shape index: {}]   ;;  %s3568_s12 = inlined_call_operand.vmem [shape: f32[2,9,32], index: 12, kind: input, shape index: {}]   ;;  %s3569_s13 = inlined_call_operand.vmem [shape: f32[32,128], index: 13, kind: input, shape index: {}]   ;;  %s3570_s14 = inlined_call_operand.vmem [shape: f32[1,128], index: 14, kind: input, shape index: {}]   ;;  %s3571_s15 = inlined_call_operand.hbm [shape: f32[16,128], index: 15, kind: output, shape index: {}]  }
   0x1   :  { %21 = vsyncpa [#allocation4], 0  ;;  %s2829_s18 = smov [#allocation2]  }
   0x2   :  { %s47_s19 = sshll.u32 %s2829_s18, 4  ;;  %s48_s19 = int_to_ptr.vmem [resolvable:$true] %s47_s19 }
   0x3   :  { %s2793_s20 = scalar_lea.vmem %s48_s19, 32  ;;  %p2798_p1 = scmp.lt.s32.totalorder %s48_s19, %s48_s19 }
   0x4   :  { %p2794_p0 = scmp.ne.s32.totalorder %s48_s19, %s2793_s20  ;;  %p2799_p2 = scmp.lt.s32.totalorder %s2793_s20, %s2793_s20 }
   0x6   :  { %p2800_p3 = por %p2799_p2, %p2798_p1 }
   0x8   :  { %p2801_p4 = pnand %p2800_p3, %p2794_p0 }
   0xa   :  { %2804 = shalt.err (!%p2801_p4)
}
   0xb   :  { %s2830_s21 = smov 16   ;;  %s2831_s22 = smov 1  }
   0xc   :  { %53 = dma.hbm_to_vmem [thread:$0]  %s3566_s10, 32, %s48_s19, [#allocation3], %s2830_s21, %s2830_s21, %s2831_s22  }
   0xd   :  { %2825 = dma.done.wait [#allocation3], 32  }
   0xe   :  { %2826 = vsyncadd [#allocation3], 4294967264  ;;  %vm106_vm0 = vcmask 261120   ;;  %v98_v0 = vld [vmem:[%s3561_s5 + $0x18] sm:$0xff]  ;;  %v97_v1 = vld [vmem:[%s3561_s5 + $0x10] sm:$0xff]  ;;  %vm335_vm1 = vcmask 130048  }
   0xf   :  { %2460 = vmatprep.subr.mxu0 %v98_v0  ;;  %v2931_v2 = vld [vmem:[%s3556_s0] sm:$0xff]  ;;  %v96_v3 = vld [vmem:[%s3561_s5 + $0x8] sm:$0xff]  ;;  %v2979_v16 = vld [vmem:[%s3559_s3 + $0x10] sm:$0xff]  ;;  %vm990_vm4 = vcmask 523264  }
  0x10   :  { %2461 = vmatpush3.msra.mxu0 %v98_v0  ;;  %2468 = vmatprep.mubr.msk.f32.mxu0 %vm106_vm0, %v2931_v2  ;;  %v95_v4 = vld [vmem:[%s3561_s5] sm:$0xff]  ;;  %v2944_v5 = vld [vmem:[%s3556_s0 + $0x8] sm:$0xff]  ;;  %s2832_s0 = smov 96   ;;  %v2986_v19 = vmul.f32 0.35355338, %v2979_v16  ;;  %v2991_v20 = vld [vmem:[%s3559_s3 + $0x18] sm:$0xff] }
  0x11   :  { %2462 = vmatprep.subr.mxu0 %v97_v1  ;;  %v2254_v6 = vld [vmem:[%s3562_s6] ss:$0 sm:$0xff]  ;;  %v2973_v15 = vld [vmem:[%s3559_s3 + $0x8] sm:$0xff]  ;;  %v3003_v23 = vmul.f32 0.35355338, %v2991_v20  ;;  %v3019_v27 = vld [vmem:[%s3559_s3 + $0x30] sm:$0xff] }
  0x12   :  { %2463 = vmatpush3.msra.mxu0 %v97_v1  ;;  %v2954_v7 = vld [vmem:[%s3559_s3] sm:$0xff]  ;;  %v2983_v17 = vmul.f32 0.35355338, %v2973_v15  ;;  %v3013_v26 = vld [vmem:[%s3559_s3 + $0x28] sm:$0xff]  ;;  %v3030_v31 = vmul.f32 0.35355338, %v3019_v27 }
  0x13   :  { %2464 = vmatprep.subr.mxu0 %v96_v3  ;;  %v2959_v10 = vmul.f32 0.35355338, %v2954_v7  ;;  %v2997_v21 = vld [vmem:[%s3559_s3 + $0x20] sm:$0xff]  ;;  %v3025_v29 = vmul.f32 0.35355338, %v3013_v26  ;;  %v3035_v32 = vld [vmem:[%s3559_s3 + $0x38] sm:$0xff] }
  0x14   :  { %2465 = vmatpush3.msra.mxu0 %v96_v3  ;;  %v3008_v25 = vmul.f32 0.35355338, %v2997_v21  ;;  %v3042_v34 = vmul.f32 0.35355338, %v3035_v32  ;;  %v3054_v37 = vld [vmem:[%s3558_s2 + $0x8] sm:$0xff]  ;;  %v3059_v39 = vld [vmem:[%s3558_s2] sm:$0xff] }
  0x15   :  { %2466 = vmatprep.subr.mxu0 %v95_v4  ;;  %v3067_v44 = vld [vmem:[%s3558_s2 + $0x18] sm:$0xff]  ;;  %v3072_v46 = vld [vmem:[%s3558_s2 + $0x10] sm:$0xff]  ;;  %v3080_v51 = vld [vmem:[%s3558_s2 + $0x28] sm:$0xff] }
  0x16   :  { %2467 = vmatpush3.msra.mxu0 %v95_v4  ;;  %v3088_v57 = vld [vmem:[%s3558_s2 + $0x20] sm:$0xff]  ;;  %v3095_v62 = vld [vmem:[%s3558_s2 + $0x30] sm:$0xff]  ;;  %v3102_v1 = vld [vmem:[%s3558_s2 + $0x38] sm:$0xff]  ;;  %s2833_s2 = smov 64  }
  0x17   :  { %2469 = vmatmul.mubr.msk.f32.vlgmr.msra.gmra.mxu0 %vm106_vm0, %v2944_v5 }
  0xd7   :  { %v2470_v8 = vpop.f32.mrf.mxu0 }
  0xd8   :  { %v2956_v9 = vadd.f32 %v2470_v8, %v2254_v6 }
  0xd9   :  { %v179_v11 = vpop.f32.mrf.mxu0 }
  0xda   :  { %v2961_v12 = vadd.f32 %v2254_v6, %v179_v11  ;;  %200 = vrot.lane.b32.xlu0 %v2956_v9, %s2832_s0  ;;  %v189_v22 = vmul.f32 %v2956_v9, %v2983_v17  ;;  %v191_v28 = vmul.f32 %v2956_v9, %v3003_v23  ;;  %v193_v33 = vmul.f32 %v2956_v9, %v3025_v29 }
  0xdb   :  { %v195_v36 = vmul.f32 %v2956_v9, %v3042_v34 }
  0xdc   :  { %v188_v13 = vmul.f32 %v2961_v12, %v2959_v10  ;;  %v190_v24 = vmul.f32 %v2961_v12, %v2986_v19  ;;  %v192_v30 = vmul.f32 %v2961_v12, %v3008_v25  ;;  %v194_v35 = vmul.f32 %v2961_v12, %v3030_v31 }
  0xde   :  { %198 = vrot.lane.b32.xlu0 %v2961_v12, %s2832_s0  ;;  %2475 = vmatprep.mubr.msk.f32.mxu1 %vm106_vm0, %v188_v13 }
 0x14c   :  { %v201_v14 = vpop.permute.xlu0 %200 }
 0x14d   :  { %2471 = vmatprep.subr.msk.mxu1 %vm106_vm0, %v201_v14 }
 0x14e   :  { %2472 = vmatpush3.xpose.msk.msra.mxu1 %vm106_vm0, %v201_v14 }
 0x150   :  { %v199_v18 = vpop.permute.xlu0 %198 }
 0x151   :  { %2473 = vmatprep.subr.msk.mxu1 %vm106_vm0, %v199_v18 }
 0x152   :  { %2474 = vmatpush3.xpose.msk.msra.mxu1 %vm106_vm0, %v199_v18 }
 0x155   :  { %2476 = vmatmul.mubr.msk.f32.vlgmr.msra.gmra.mxu1 %vm106_vm0, %v189_v22 }
 0x156   :  { %2478 = vmatprep.mubr.msk.f32.mxu1 %vm106_vm0, %v190_v24 }
 0x159   :  { %2479 = vmatmul.mubr.msk.f32.gmra.mxu1 %vm106_vm0, %v191_v28 }
 0x15a   :  { %2481 = vmatprep.mubr.msk.f32.mxu1 %vm106_vm0, %v192_v30 }
 0x15d   :  { %2482 = vmatmul.mubr.msk.f32.gmra.mxu1 %vm106_vm0, %v193_v33 }
 0x15e   :  { %2484 = vmatprep.mubr.msk.f32.mxu1 %vm106_vm0, %v194_v35 }
 0x161   :  { %2485 = vmatmul.mubr.msk.f32.gmra.mxu1 %vm106_vm0, %v195_v36 }
 0x215   :  { %v2477_v38 = vpop.f32.mrf.mxu1 }
 0x216   :  { %v302_v40 = vadd.f32 %v2477_v38, %v3054_v37 }
 0x217   :  { %v296_v41 = vpop.f32.mrf.mxu1 }
 0x218   :  { %v297_v42 = vadd.f32 %v296_v41, %v3059_v39  ;;  %v339_v43 = vsel %vm335_vm1, %v302_v40, -inf }
 0x219   :  { %340 = vmax.xlane.f32.xlu1 %v339_v43  ;;  %v2480_v45 = vpop.f32.mrf.mxu1 }
 0x21a   :  { %v312_v48 = vadd.f32 %v2480_v45, %v3067_v44  ;;  %v336_v50 = vsel %vm335_vm1, %v297_v42, -inf }
 0x21b   :  { %v306_v47 = vpop.f32.mrf.mxu1 }
 0x21c   :  { %v307_v49 = vadd.f32 %v306_v47, %v3072_v46  ;;  %v345_v56 = vsel %vm335_vm1, %v312_v48, -inf }
 0x21d   :  { %v2483_v52 = vpop.f32.mrf.mxu1  ;;  %337 = vmax.xlane.f32.xlu1 %v336_v50 }
 0x21e   :  { %v342_v53 = vsel %vm335_vm1, %v307_v49, -inf  ;;  %v322_v55 = vadd.f32 %v2483_v52, %v3080_v51 }
 0x21f   :  { %v316_v54 = vpop.f32.mrf.mxu1  ;;  %343 = vmax.xlane.f32.xlu0 %v342_v53 }
 0x220   :  { %v317_v59 = vadd.f32 %v316_v54, %v3088_v57  ;;  %v351_v60 = vsel %vm335_vm1, %v322_v55, -inf }
 0x221   :  { %v2486_v58 = vpop.f32.mrf.mxu1  ;;  %346 = vmax.xlane.f32.xlu1 %v345_v56 }
 0x222   :  { %v348_v0 = vsel %vm335_vm1, %v317_v59, -inf  ;;  %v332_v3 = vadd.f32 %v2486_v58, %v3102_v1 }
 0x223   :  { %v326_v61 = vpop.f32.mrf.mxu1 }
 0x224   :  { %v327_v63 = vadd.f32 %v326_v61, %v3095_v62  ;;  %v357_v6 = vsel %vm335_vm1, %v332_v3, -inf }
 0x225   :  { %352 = vmax.xlane.f32.xlu1 %v351_v60 }
 0x226   :  { %v354_v4 = vsel %vm335_vm1, %v327_v63, -inf }
 0x229   :  { %349 = vmax.xlane.f32.xlu1 %v348_v0 }
 0x22d   :  { %355 = vmax.xlane.f32.xlu1 %v354_v4 }
 0x231   :  { %358 = vmax.xlane.f32.xlu1 %v357_v6 }
 0x2a2   :  { %v341_v8 = vpop.xlane.xlu1 %340 }
 0x2a3   :  { %v361_v11 = vsub.f32 %v302_v40, %v341_v8 }
 0x2a5   :  { %v370_v13 = vmul.f32 1.442695, %v361_v11 }
 0x2a6   :  { %v338_v14 = vpop.xlane.xlu1 %337 }
 0x2a7   :  { %2673 = vpow2.f32 %v370_v13  ;;  %v360_v18 = vsub.f32 %v297_v42, %v338_v14 }
 0x2a8   :  { %v344_v22 = vpop.xlane.xlu0 %343 }
 0x2a9   :  { %v368_v24 = vmul.f32 1.442695, %v360_v18  ;;  %v362_v28 = vsub.f32 %v307_v49, %v344_v22 }
 0x2aa   :  { %v347_v30 = vpop.xlane.xlu1 %346 }
 0x2ab   :  { %2675 = vpow2.f32 %v368_v24  ;;  %v372_v33 = vmul.f32 1.442695, %v362_v28  ;;  %v363_v35 = vsub.f32 %v312_v48, %v347_v30 }
 0x2ad   :  { %2677 = vpow2.f32 %v372_v33  ;;  %v374_v36 = vmul.f32 1.442695, %v363_v35 }
 0x2ae   :  { %v353_v38 = vpop.xlane.xlu1 %352 }
 0x2af   :  { %2679 = vpow2.f32 %v374_v36  ;;  %v365_v41 = vsub.f32 %v322_v55, %v353_v38 }
 0x2b1   :  { %v378_v43 = vmul.f32 1.442695, %v365_v41 }
 0x2b2   :  { %v350_v45 = vpop.xlane.xlu1 %349 }
 0x2b3   :  { %2681 = vpow2.f32 %v378_v43  ;;  %v364_v40 = vsub.f32 %v317_v59, %v350_v45 }
 0x2b4   :  { %v3107_v47 = vpop.eup %2673 }
 0x2b5   :  { %v376_v50 = vmul.f32 1.442695, %v364_v40  ;;  %v387_v42 = vsel %vm335_vm1, %v3107_v47, 0.0 }
 0x2b6   :  { %388 = vadd.xlane.f32.xlu1 %v387_v42  ;;  %v356_v49 = vpop.xlane.xlu1 %355 }
 0x2b7   :  { %2683 = vpow2.f32 %v376_v50  ;;  %v366_v52 = vsub.f32 %v327_v63, %v356_v49 }
 0x2b8   :  { %v2676_v48 = vpop.eup %2675 }
 0x2b9   :  { %v380_v53 = vmul.f32 1.442695, %v366_v52  ;;  %v384_v54 = vsel %vm335_vm1, %v2676_v48, 0.0 }
 0x2ba   :  { %v2678_v56 = vpop.eup %2677  ;;  %385 = vadd.xlane.f32.xlu1 %v384_v54  ;;  %v359_v55 = vpop.xlane.xlu1 %358 }
 0x2bb   :  { %2685 = vpow2.f32 %v380_v53  ;;  %v367_v58 = vsub.f32 %v332_v3, %v359_v55  ;;  %v390_v61 = vsel %vm335_vm1, %v2678_v56, 0.0 }
 0x2bc   :  { %v2680_v59 = vpop.eup %2679 }
 0x2bd   :  { %v382_v60 = vmul.f32 1.442695, %v367_v58  ;;  %v393_v0 = vsel %vm335_vm1, %v2680_v59, 0.0 }
 0x2be   :  { %391 = vadd.xlane.f32.xlu1 %v390_v61  ;;  %394 = vadd.xlane.f32.xlu0 %v393_v0  ;;  %v574_v61 = vld [vmem:[%s3563_s7 + $0x8] sm:$0xff]  ;;  %v573_v0 = vld [vmem:[%s3563_s7] sm:$0xff] }
 0x2bf   :  { %2687 = vpow2.f32 %v382_v60 }
 0x2c0   :  { %v2682_v4 = vpop.eup %2681 }
 0x2c1   :  { %v399_v63 = vsel %vm335_vm1, %v2682_v4, 0.0 }
 0x2c2   :  { %400 = vadd.xlane.f32.xlu0 %v399_v63 }
 0x2c4   :  { %v2684_v6 = vpop.eup %2683 }
 0x2c5   :  { %v396_v8 = vsel %vm335_vm1, %v2684_v6, 0.0 }
 0x2c6   :  { %397 = vadd.xlane.f32.xlu1 %v396_v8 }
 0x2c8   :  { %v2686_v11 = vpop.eup %2685 }
 0x2c9   :  { %v402_v3 = vsel %vm335_vm1, %v2686_v11, 0.0 }
 0x2ca   :  { %403 = vadd.xlane.f32.xlu1 %v402_v3 }
 0x2cc   :  { %v2688_v13 = vpop.eup %2687 }
 0x2cd   :  { %v405_v14 = vsel %vm335_vm1, %v2688_v13, 0.0 }
 0x2ce   :  { %406 = vadd.xlane.f32.xlu0 %v405_v14 }
 0x2db   :  { %426 = vrot.lane.b32.xlu1 %v2956_v9, %s2833_s2 }
 0x2e4   :  { %424 = vrot.lane.b32.xlu0 %v2961_v12, %s2833_s2 }
 0x33f   :  { %v389_v18 = vpop.xlane.xlu1 %388 }
 0x343   :  { %v386_v22 = vpop.xlane.xlu1 %385 }
 0x344   :  { %2689 = vrcp.f32 %v386_v22 }
 0x345   :  { %2691 = vrcp.f32 %v389_v18 }
 0x347   :  { %v392_v24 = vpop.xlane.xlu1 %391  ;;  %v395_v28 = vpop.xlane.xlu0 %394 }
 0x348   :  { %2693 = vrcp.f32 %v392_v24 }
 0x349   :  { %2695 = vrcp.f32 %v395_v28 }
 0x34b   :  { %v401_v35 = vpop.xlane.xlu0 %400 }
 0x34f   :  { %v398_v30 = vpop.xlane.xlu1 %397 }
 0x350   :  { %2697 = vrcp.f32 %v398_v30 }
 0x351   :  { %v2690_v33 = vpop.eup %2689  ;;  %2699 = vrcp.f32 %v401_v35 }
 0x352   :  { %v416_v36 = vmul.f32 %v2690_v33, %v2676_v48  ;;  %v2692_v41 = vpop.eup %2691 }
 0x353   :  { %v404_v38 = vpop.xlane.xlu1 %403  ;;  %v417_v40 = vmul.f32 %v2692_v41, %v3107_v47 }
 0x354   :  { %2491 = vmatprep.mubr.msk.f32.mxu0 %vm335_vm1, %v416_v36  ;;  %2701 = vrcp.f32 %v404_v38 }
 0x355   :  { %v2694_v43 = vpop.eup %2693 }
 0x356   :  { %v2696_v50 = vpop.eup %2695  ;;  %v418_v42 = vmul.f32 %v2694_v43, %v2678_v56  ;;  %v576_v56 = vld [vmem:[%s3563_s7 + $0x18] sm:$0xff]  ;;  %v577_v43 = vlaneseq }
 0x357   :  { %v407_v9 = vpop.xlane.xlu0 %406  ;;  %v427_v12 = vpop.permute.xlu1 %426  ;;  %v419_v52 = vmul.f32 %v2696_v50, %v2680_v59  ;;  %2503 = vmatprep.subr.mxu1 %v576_v56  ;;  %v575_v59 = vld [vmem:[%s3563_s7 + $0x10] sm:$0xff]  ;;  %v3185_v50 = vld [vmem:[%s3568_s12] sm:$0xff] }
 0x358   :  { %2703 = vrcp.f32 %v407_v9  ;;  %2487 = vmatprep.subr.mxu0 %v427_v12  ;;  %2504 = vmatpush3.msra.mxu1 %v576_v56 }
 0x359   :  { %2488 = vmatpush3.msra.mxu0 %v427_v12  ;;  %2505 = vmatprep.subr.mxu1 %v575_v59 }
 0x35a   :  { %2506 = vmatpush3.msra.mxu1 %v575_v59 }
 0x35b   :  { %v425_v45 = vpop.permute.xlu0 %424  ;;  %2507 = vmatprep.subr.mxu1 %v574_v61 }
 0x35c   :  { %2489 = vmatprep.subr.mxu0 %v425_v45  ;;  %2508 = vmatpush3.msra.mxu1 %v574_v61 }
 0x35d   :  { %2490 = vmatpush3.msra.mxu0 %v425_v45  ;;  %v2698_v49 = vpop.eup %2697  ;;  %2509 = vmatprep.subr.mxu1 %v573_v0  ;;  %v3179_v45 = vshrl.u32 %v577_v43, 7 }
 0x35e   :  { %2492 = vmatmul.mubr.msk.f32.vlgmr.msra.gmra.mxu0 %vm335_vm1, %v417_v40  ;;  %v2700_v48 = vpop.eup %2699  ;;  %v420_v53 = vmul.f32 %v2698_v49, %v2684_v6  ;;  %2510 = vmatpush3.msra.mxu1 %v573_v0 }
 0x35f   :  { %2494 = vmatprep.mubr.msk.f32.mxu0 %vm335_vm1, %v418_v42  ;;  %v421_v55 = vmul.f32 %v2700_v48, %v2682_v4  ;;  %v579_v40 = vsub.s32 0, %v3179_v45 }
 0x361   :  { %v2702_v54 = vpop.eup %2701  ;;  %v580_v42 = vrot.slane %v3185_v50, %v579_v40 }
 0x362   :  { %2495 = vmatmul.mubr.msk.f32.gmra.mxu0 %vm335_vm1, %v419_v52  ;;  %v422_v60 = vmul.f32 %v2702_v54, %v2686_v11 }
 0x363   :  { %2497 = vmatprep.mubr.msk.f32.mxu0 %vm335_vm1, %v420_v53 }
 0x365   :  { %v2704_v58 = vpop.eup %2703 }
 0x366   :  { %2498 = vmatmul.mubr.msk.f32.gmra.mxu0 %vm335_vm1, %v421_v55  ;;  %v423_v47 = vmul.f32 %v2704_v58, %v2688_v13 }
 0x367   :  { %2500 = vmatprep.mubr.msk.f32.mxu0 %vm335_vm1, %v422_v60 }
 0x36a   :  { %2501 = vmatmul.mubr.msk.f32.gmra.mxu0 %vm335_vm1, %v423_v47 }
 0x41e   :  { %v2493_v4 = vpop.f32.mrf.mxu0 }
 0x41f   :  { %v560_v24 = vmul.f32 %v2493_v4, %v2973_v15  ;;  %v705_v15 = vld [vmem:[%s3564_s8 + $0x10] sm:$0xff] }
 0x420   :  { %v520_v63 = vpop.f32.mrf.mxu0 }
 0x421   :  { %v559_v18 = vmul.f32 %v520_v63, %v2954_v7  ;;  %v706_v7 = vld [vmem:[%s3564_s8 + $0x18] sm:$0xff] }
 0x422   :  { %v2496_v6 = vpop.f32.mrf.mxu0  ;;  %2514 = vmatprep.subr.mxu0 %v706_v7 }
 0x423   :  { %v562_v13 = vmul.f32 %v2496_v6, %v2991_v20  ;;  %2515 = vmatpush3.msra.mxu0 %v706_v7 }
 0x424   :  { %v530_v8 = vpop.f32.mrf.mxu0  ;;  %2516 = vmatprep.subr.mxu0 %v705_v15 }
 0x425   :  { %v561_v3 = vmul.f32 %v530_v8, %v2979_v16  ;;  %v568_v35 = vadd.f32 %v562_v13, %v560_v24  ;;  %2517 = vmatpush3.msra.mxu0 %v705_v15  ;;  %v693_v24 = vsub.s32 3, %v3179_v45 }
 0x426   :  { %v2499_v11 = vpop.f32.mrf.mxu0 }
 0x427   :  { %v564_v28 = vmul.f32 %v2499_v11, %v3013_v26  ;;  %v567_v33 = vadd.f32 %v561_v3, %v559_v18  ;;  %v704_v26 = vld [vmem:[%s3564_s8 + $0x8] sm:$0xff] }
 0x428   :  { %v540_v14 = vpop.f32.mrf.mxu0  ;;  %2518 = vmatprep.subr.mxu0 %v704_v26 }
 0x429   :  { %v563_v22 = vmul.f32 %v540_v14, %v2997_v21  ;;  %v570_v12 = vadd.f32 %v568_v35, %v564_v28  ;;  %v3162_v21 = vld [vmem:[%s3557_s1] sm:$0xff]  ;;  %2519 = vmatpush3.msra.mxu0 %v704_v26  ;;  %v699_v28 = vsub.s32 4, %v3179_v45 }
 0x42a   :  { %v2502_v30 = vpop.f32.mrf.mxu0  ;;  %2522 = vmatprep.mubr.msk.f32.mxu0 %vm106_vm0, %v3162_v21 }
 0x42b   :  { %v566_v36 = vmul.f32 %v2502_v30, %v3035_v32  ;;  %v569_v9 = vadd.f32 %v567_v33, %v563_v22  ;;  %v3175_v32 = vld [vmem:[%s3557_s1 + $0x8] sm:$0xff]  ;;  %v709_v22 = vsub.s32 1, %v3179_v45  ;;  %v694_v33 = vrot.slane %v3185_v50, %v693_v24  ;;  %s2836_s1 = smov [#allocation5]  }
 0x42c   :  { %v550_v38 = vpop.f32.mrf.mxu0 }
 0x42d   :  { %v565_v16 = vmul.f32 %v550_v38, %v3019_v27  ;;  %v572_v41 = vadd.f32 %v570_v12, %v566_v36  ;;  %v703_v27 = vld [vmem:[%s3564_s8] sm:$0xff]  ;;  %v710_v30 = vrot.slane %v3185_v50, %v709_v22 }
 0x42e   :  { %2520 = vmatprep.subr.mxu0 %v703_v27 }
 0x42f   :  { %v571_v20 = vadd.f32 %v569_v9, %v565_v16  ;;  %2521 = vmatpush3.msra.mxu0 %v703_v27  ;;  %v700_v9 = vrot.slane %v3185_v50, %v699_v28 }
 0x430   :  { %2523 = vmatmul.mubr.msk.f32.vlgmr.msra.gmra.mxu0 %vm106_vm0, %v3175_v32 }
 0x431   :  { %2511 = vmatprep.mubr.msk.f32.mxu1 %vm106_vm0, %v571_v20 }
 0x432   :  { %2512 = vmatmul.mubr.msk.f32.vlgmr.msra.gmra.mxu1 %vm106_vm0, %v572_v41 }
 0x4f0   :  { %v2524_v36 = vpop.f32.mrf.mxu0 }
 0x4f1   :  { %v789_v12 = vadd.f32 %v2524_v36, %v710_v30 }
 0x4f2   :  { %v2513_v49 = vpop.f32.mrf.mxu1  ;;  %v783_v7 = vpop.f32.mrf.mxu0 }
 0x4f3   :  { %v659_v52 = vadd.f32 %v2513_v49, %v580_v42  ;;  %v784_v27 = vadd.f32 %v783_v7, %v710_v30 }
 0x4f4   :  { %v653_v48 = vpop.f32.mrf.mxu1 }
 0x4f5   :  { %v654_v53 = vadd.f32 %v653_v48, %v580_v42  ;;  %v663_v54 = vadd.f32 %v659_v52, %v2944_v5 }
 0x4f7   :  { %v667_v55 = vsel %vm106_vm0, %v663_v54, 0.0  ;;  %v662_v58 = vadd.f32 %v654_v53, %v2931_v2 }
 0x4f8   :  { %668 = vadd.xlane.f32.xlu0 %v667_v55 }
 0x4f9   :  { %v664_v60 = vsel %vm106_vm0, %v662_v58, 0.0 }
 0x4fa   :  { %665 = vadd.xlane.f32.xlu1 %v664_v60 }
 0x581   :  { %v669_v47 = vpop.xlane.xlu0 %668 }
 0x582   :  { %v672_v56 = vmul.f32 0.03125, %v669_v47 }
 0x583   :  { %v666_v59 = vpop.xlane.xlu1 %665 }
 0x584   :  { %v674_v61 = vsub.f32 %v663_v54, %v672_v56  ;;  %v671_v0 = vmul.f32 0.03125, %v666_v59 }
 0x586   :  { %v673_v4 = vsub.f32 %v662_v58, %v671_v0  ;;  %v676_v63 = vmul.f32 %v674_v61, %v674_v61 }
 0x588   :  { %v680_v6 = vsel %vm106_vm0, %v676_v63, 0.0  ;;  %v675_v8 = vmul.f32 %v673_v4, %v673_v4  ;;  %v834_v63 = vld [vmem:[%s3565_s9 + $0x10] sm:$0xff] }
 0x589   :  { %681 = vadd.xlane.f32.xlu0 %v680_v6  ;;  %v833_v6 = vld [vmem:[%s3565_s9 + $0x8] sm:$0xff] }
 0x58a   :  { %v677_v5 = vsel %vm106_vm0, %v675_v8, 0.0  ;;  %v832_v8 = vld [vmem:[%s3565_s9] sm:$0xff] }
 0x58b   :  { %678 = vadd.xlane.f32.xlu1 %v677_v5 }
 0x612   :  { %v682_v11 = vpop.xlane.xlu0 %681 }
 0x613   :  { %v684_v2 = vmul.f32 0.03125, %v682_v11 }
 0x614   :  { %v679_v3 = vpop.xlane.xlu1 %678 }
 0x615   :  { %v686_v13 = vadd.f32 1e-05, %v684_v2  ;;  %v683_v14 = vmul.f32 0.03125, %v679_v3 }
 0x617   :  { %2705 = vrsqrt.f32 %v686_v13  ;;  %v685_v18 = vadd.f32 1e-05, %v683_v14 }
 0x619   :  { %2707 = vrsqrt.f32 %v685_v18  ;;  %v822_v18 = vsub.s32 5, %v3179_v45 }
 0x624   :  { %v2706_v35 = vpop.eup %2705 }
 0x625   :  { %v690_v38 = vmul.f32 %v2706_v35, %v674_v61  ;;  %v828_v35 = vsub.s32 6, %v3179_v45 }
 0x626   :  { %v2708_v16 = vpop.eup %2707 }
 0x627   :  { %v696_v20 = vmul.f32 %v694_v33, %v690_v38  ;;  %v689_v41 = vmul.f32 %v2708_v16, %v673_v4  ;;  %v835_v4 = vld [vmem:[%s3565_s9 + $0x18] sm:$0xff] }
 0x628   :  { %2525 = vmatprep.subr.mxu1 %v835_v4 }
 0x629   :  { %v702_v15 = vadd.f32 %v700_v9, %v696_v20  ;;  %v695_v26 = vmul.f32 %v694_v33, %v689_v41  ;;  %2526 = vmatpush3.msra.mxu1 %v835_v4  ;;  %v823_v33 = vrot.slane %v3185_v50, %v822_v18 }
 0x62a   :  { %2527 = vmatprep.subr.mxu1 %v834_v63 }
 0x62b   :  { %v793_v43 = vadd.f32 %v789_v12, %v702_v15  ;;  %v701_v42 = vadd.f32 %v700_v9, %v695_v26  ;;  %2528 = vmatpush3.msra.mxu1 %v834_v63  ;;  %v829_v12 = vrot.slane %v3185_v50, %v828_v35  ;;  %v985_v15 = vld [vmem:[%s3567_s11 + $0x38] sm:$0xff]  ;;  %v984_v26 = vld [vmem:[%s3567_s11 + $0x30] sm:$0xff] }
 0x62c   :  { %2529 = vmatprep.subr.mxu1 %v833_v6  ;;  %2536 = vmatprep.subr.mxu0 %v985_v15 }
 0x62d   :  { %v797_v49 = vsel %vm106_vm0, %v793_v43, 0.0  ;;  %v792_v52 = vadd.f32 %v784_v27, %v701_v42  ;;  %2530 = vmatpush3.msra.mxu1 %v833_v6  ;;  %2537 = vmatpush3.msra.mxu0 %v985_v15  ;;  %v983_v27 = vld [vmem:[%s3567_s11 + $0x28] sm:$0xff]  ;;  %v981_v42 = vld [vmem:[%s3567_s11 + $0x18] sm:$0xff] }
 0x62e   :  { %798 = vadd.xlane.f32.xlu0 %v797_v49  ;;  %2531 = vmatprep.subr.mxu1 %v832_v8  ;;  %v980_v49 = vld [vmem:[%s3567_s11 + $0x10] sm:$0xff] }
 0x62f   :  { %v794_v48 = vsel %vm106_vm0, %v792_v52, 0.0  ;;  %2532 = vmatpush3.msra.mxu1 %v832_v8  ;;  %2538 = vmatprep.subr.mxu0 %v984_v26 }
 0x630   :  { %795 = vadd.xlane.f32.xlu1 %v794_v48  ;;  %2539 = vmatpush3.msra.mxu0 %v984_v26  ;;  %v978_v48 = vld [vmem:[%s3567_s11] sm:$0xff] }
 0x631   :  { %2540 = vmatprep.subr.mxu0 %v983_v27 }
 0x632   :  { %2541 = vmatpush3.msra.mxu0 %v983_v27 }
 0x6b7   :  { %v799_v53 = vpop.xlane.xlu0 %798 }
 0x6b8   :  { %v801_v54 = vmul.f32 0.03125, %v799_v53  ;;  %v2279_v53 = vld [vmem:[#allocation2] ss:$0 sm:$0xff] }
 0x6b9   :  { %v796_v55 = vpop.xlane.xlu1 %795 }
 0x6ba   :  { %v803_v58 = vsub.f32 %v793_v43, %v801_v54  ;;  %v800_v60 = vmul.f32 0.03125, %v796_v55  ;;  %v982_v43 = vld [vmem:[%s3567_s11 + $0x20] sm:$0xff] }
 0x6bb   :  { %2542 = vmatprep.subr.mxu0 %v982_v43 }
 0x6bc   :  { %v802_v47 = vsub.f32 %v792_v52, %v800_v60  ;;  %v805_v56 = vmul.f32 %v803_v58, %v803_v58  ;;  %2543 = vmatpush3.msra.mxu0 %v982_v43  ;;  %v979_v52 = vld [vmem:[%s3567_s11 + $0x8] sm:$0xff] }
 0x6bd   :  { %2544 = vmatprep.subr.mxu0 %v981_v42 }
 0x6be   :  { %v809_v59 = vsel %vm106_vm0, %v805_v56, 0.0  ;;  %v804_v61 = vmul.f32 %v802_v47, %v802_v47  ;;  %2545 = vmatpush3.msra.mxu0 %v981_v42 }
 0x6bf   :  { %810 = vadd.xlane.f32.xlu0 %v809_v59  ;;  %2546 = vmatprep.subr.mxu0 %v980_v49 }
 0x6c0   :  { %v806_v0 = vsel %vm106_vm0, %v804_v61, 0.0  ;;  %2547 = vmatpush3.msra.mxu0 %v980_v49 }
 0x6c1   :  { %807 = vadd.xlane.f32.xlu1 %v806_v0  ;;  %2548 = vmatprep.subr.mxu0 %v979_v52 }
 0x6c2   :  { %2549 = vmatpush3.msra.mxu0 %v979_v52 }
 0x6c3   :  { %2550 = vmatprep.subr.mxu0 %v978_v48 }
 0x6c4   :  { %2551 = vmatpush3.msra.mxu0 %v978_v48 }
 0x748   :  { %v811_v5 = vpop.xlane.xlu0 %810 }
 0x749   :  { %v813_v11 = vmul.f32 0.03125, %v811_v5 }
 0x74a   :  { %v808_v2 = vpop.xlane.xlu1 %807 }
 0x74b   :  { %v815_v3 = vadd.f32 1e-05, %v813_v11  ;;  %v812_v13 = vmul.f32 0.03125, %v808_v2 }
 0x74d   :  { %2709 = vrsqrt.f32 %v815_v3  ;;  %v814_v14 = vadd.f32 1e-05, %v812_v13 }
 0x74f   :  { %2711 = vrsqrt.f32 %v814_v14 }
 0x75a   :  { %v2710_v30 = vpop.eup %2709 }
 0x75b   :  { %v819_v36 = vmul.f32 %v2710_v30, %v803_v58 }
 0x75c   :  { %v2712_v38 = vpop.eup %2711 }
 0x75d   :  { %v818_v9 = vmul.f32 %v2712_v38, %v802_v47  ;;  %v825_v16 = vmul.f32 %v823_v33, %v819_v36 }
 0x75f   :  { %v824_v20 = vmul.f32 %v823_v33, %v818_v9  ;;  %v3234_v7 = vadd.f32 %v829_v12, %v825_v16 }
 0x761   :  { %v3232_v41 = vadd.f32 %v829_v12, %v824_v20 }
 0x763   :  { %2533 = vmatprep.mubr.msk.f32.mxu1 %vm106_vm0, %v3232_v41 }
 0x764   :  { %2534 = vmatmul.mubr.msk.f32.vlgmr.msra.gmra.mxu1 %vm106_vm0, %v3234_v7 }
 0x824   :  { %v2535_v54 = vpop.f32.mrf.mxu1 }
 0x825   :  { %v921_v55 = vadd.f32 %v2535_v54, %v2279_v53 }
 0x826   :  { %v915_v58 = vpop.f32.mrf.mxu1 }
 0x827   :  { %v927_v60 = vmul.f32 0.70710677, %v921_v55  ;;  %v916_v47 = vadd.f32 %v2279_v53, %v915_v58 }
 0x829   :  { %v933_v56 = vand.u32 2147483647, %v927_v60  ;;  %v926_v59 = vmul.f32 0.70710677, %v916_v47  ;;  %vm929_vm2 = vcmp.ge.f32.partialorder %v927_v60, 0.0 }
 0x82b   :  { %v935_v61 = vmul.f32 0.3275911, %v933_v56  ;;  %v932_v0 = vand.u32 2147483647, %v926_v59  ;;  %v961_v8 = vsub.f32 0.0, %v933_v56  ;;  %vm928_vm3 = vcmp.ge.f32.partialorder %v926_v59, 0.0 }
 0x82d   :  { %v937_v4 = vadd.f32 1.0, %v935_v61  ;;  %v934_v63 = vmul.f32 0.3275911, %v932_v0  ;;  %v960_v5 = vsub.f32 0.0, %v932_v0  ;;  %v963_v11 = vmul.f32 %v961_v8, %v933_v56 }
 0x82f   :  { %2713 = vrcp.f32 %v937_v4  ;;  %v936_v6 = vadd.f32 1.0, %v934_v63  ;;  %v962_v3 = vmul.f32 %v960_v5, %v932_v0  ;;  %v966_v14 = vmul.f32 1.442695, %v963_v11 }
 0x830   :  { %v2834_v63 = vmov -1.0  }
 0x831   :  { %2715 = vrcp.f32 %v936_v6  ;;  %v964_v38 = vmul.f32 1.442695, %v962_v3  ;;  %v931_v6 = vsel %vm929_vm2, 1.0, %v2834_v63  ;;  %v930_v3 = vsel %vm928_vm3, 1.0, %v2834_v63 }
 0x832   :  { %2717 = vpow2.f32 %v966_v14 }
 0x833   :  { %2719 = vpow2.f32 %v964_v38 }
 0x83c   :  { %v2714_v2 = vpop.eup %2713 }
 0x83d   :  { %v943_v13 = vmul.f32 1.0614054, %v2714_v2 }
 0x83e   :  { %v2716_v30 = vpop.eup %2715 }
 0x83f   :  { %v945_v33 = vadd.f32 -1.4531521, %v943_v13  ;;  %v942_v36 = vmul.f32 1.0614054, %v2716_v30  ;;  %v2718_v54 = vpop.eup %2717 }
 0x840   :  { %v2720_v0 = vpop.eup %2719 }
 0x841   :  { %v947_v9 = vmul.f32 %v2714_v2, %v945_v33  ;;  %v944_v16 = vadd.f32 -1.4531521, %v942_v36  ;;  %v924_v33 = vmul.f32 0.5, %v916_v47  ;;  %v925_v36 = vmul.f32 0.5, %v921_v55 }
 0x843   :  { %v949_v12 = vadd.f32 1.4214138, %v947_v9  ;;  %v946_v20 = vmul.f32 %v2716_v30, %v944_v16 }
 0x845   :  { %v951_v15 = vmul.f32 %v2714_v2, %v949_v12  ;;  %v948_v26 = vadd.f32 1.4214138, %v946_v20 }
 0x847   :  { %v953_v27 = vadd.f32 -0.28449672, %v951_v15  ;;  %v950_v43 = vmul.f32 %v2716_v30, %v948_v26 }
 0x849   :  { %v955_v42 = vmul.f32 %v2714_v2, %v953_v27  ;;  %v952_v49 = vadd.f32 -0.28449672, %v950_v43 }
 0x84b   :  { %v957_v52 = vadd.f32 0.2548296, %v955_v42  ;;  %v954_v48 = vmul.f32 %v2716_v30, %v952_v49 }
 0x84d   :  { %v959_v53 = vmul.f32 %v2714_v2, %v957_v52  ;;  %v956_v58 = vadd.f32 0.2548296, %v954_v48 }
 0x84f   :  { %v969_v56 = vmul.f32 %v2718_v54, %v959_v53  ;;  %v958_v61 = vmul.f32 %v2716_v30, %v956_v58  ;;  %v988_v30 = vsub.s32 2, %v3179_v45 }
 0x851   :  { %v971_v4 = vsub.f32 1.0, %v969_v56  ;;  %v968_v8 = vmul.f32 %v2720_v0, %v958_v61  ;;  %v989_v59 = vrot.slane %v3185_v50, %v988_v30  ;;  %v2289_v56 = vld [vmem:[%s3561_s5 + $0x30] sm:$0xff]  ;;  %v2288_v61 = vld [vmem:[%s3561_s5 + $0x28] sm:$0xff]  ;;  %v2287_v0 = vld [vmem:[%s3561_s5 + $0x20] sm:$0xff] }
 0x853   :  { %v973_v5 = vmul.f32 %v971_v4, %v931_v6  ;;  %v970_v11 = vsub.f32 1.0, %v968_v8 }
 0x855   :  { %v972_v13 = vmul.f32 %v970_v11, %v930_v3  ;;  %v975_v14 = vadd.f32 1.0, %v973_v5 }
 0x857   :  { %v974_v2 = vadd.f32 1.0, %v972_v13  ;;  %v977_v38 = vmul.f32 %v975_v14, %v925_v36  ;;  %v1102_v13 = vsub.s32 7, %v3179_v45  ;;  %v2343_v45 = vld [vmem:[%s3570_s14] ss:$0 sm:$0xff] }
 0x859   :  { %v976_v60 = vmul.f32 %v974_v2, %v924_v33  ;;  %v1103_v33 = vrot.slane %v3185_v50, %v1102_v13  ;;  %v2292_v50 = vld [vmem:[%s3562_s6 + $0x1] ss:$0 sm:$0xff]  ;;  %s2242_s6 = sshll.u32 %s2836_s1, 4  ;;  %s2243_s6 = int_to_ptr.vmem [resolvable:$true] %s2242_s6 }
 0x85a   :  { %p2810_p6 = scmp.lt.s32.totalorder %s2243_s6, %s2243_s6 }
 0x85b   :  { %2552 = vmatprep.mubr.msk.f32.mxu0 %vm990_vm4, %v976_v60 }
 0x85c   :  { %2553 = vmatmul.mubr.msk.f32.vlgmr.msra.gmra.mxu0 %vm990_vm4, %v977_v38 }
 0x91c   :  { %v2554_v9 = vpop.f32.mrf.mxu0 }
 0x91d   :  { %v1069_v16 = vadd.f32 %v2554_v9, %v989_v59 }
 0x91e   :  { %v1063_v12 = vpop.f32.mrf.mxu0 }
 0x91f   :  { %v1064_v20 = vadd.f32 %v1063_v12, %v989_v59  ;;  %v1073_v47 = vadd.f32 %v1069_v16, %v3234_v7  ;;  %v2284_v59 = vld [vmem:[%s3568_s12 + $0x8] ss:$0 sm:$0xff] }
 0x921   :  { %v1077_v55 = vsel %vm106_vm0, %v1073_v47, 0.0  ;;  %v1072_v15 = vadd.f32 %v1064_v20, %v3232_v41  ;;  %v2290_v41 = vld [vmem:[%s3561_s5 + $0x38] sm:$0xff] }
 0x922   :  { %1078 = vadd.xlane.f32.xlu0 %v1077_v55  ;;  %2555 = vmatprep.subr.mxu1 %v2290_v41 }
 0x923   :  { %v1074_v26 = vsel %vm106_vm0, %v1072_v15, 0.0  ;;  %2556 = vmatpush3.msra.mxu1 %v2290_v41 }
 0x924   :  { %1075 = vadd.xlane.f32.xlu1 %v1074_v26  ;;  %2557 = vmatprep.subr.mxu1 %v2289_v56 }
 0x925   :  { %2558 = vmatpush3.msra.mxu1 %v2289_v56 }
 0x926   :  { %2559 = vmatprep.subr.mxu1 %v2288_v61 }
 0x927   :  { %2560 = vmatpush3.msra.mxu1 %v2288_v61 }
 0x928   :  { %2561 = vmatprep.subr.mxu1 %v2287_v0 }
 0x929   :  { %2562 = vmatpush3.msra.mxu1 %v2287_v0 }
 0x9ab   :  { %v1079_v27 = vpop.xlane.xlu0 %1078 }
 0x9ac   :  { %v1081_v43 = vmul.f32 0.03125, %v1079_v27 }
 0x9ad   :  { %v1076_v42 = vpop.xlane.xlu1 %1075 }
 0x9ae   :  { %v1083_v49 = vsub.f32 %v1073_v47, %v1081_v43  ;;  %v1080_v52 = vmul.f32 0.03125, %v1076_v42 }
 0x9b0   :  { %v1082_v48 = vsub.f32 %v1072_v15, %v1080_v52  ;;  %v1085_v53 = vmul.f32 %v1083_v49, %v1083_v49 }
 0x9b2   :  { %v1089_v54 = vsel %vm106_vm0, %v1085_v53, 0.0  ;;  %v1084_v58 = vmul.f32 %v1082_v48, %v1082_v48 }
 0x9b3   :  { %1090 = vadd.xlane.f32.xlu0 %v1089_v54 }
 0x9b4   :  { %v1086_v7 = vsel %vm106_vm0, %v1084_v58, 0.0 }
 0x9b5   :  { %1087 = vadd.xlane.f32.xlu1 %v1086_v7 }
 0xa3c   :  { %v1091_v4 = vpop.xlane.xlu0 %1090 }
 0xa3d   :  { %v1093_v6 = vmul.f32 0.03125, %v1091_v4 }
 0xa3e   :  { %v1088_v8 = vpop.xlane.xlu1 %1087 }
 0xa3f   :  { %v1095_v5 = vadd.f32 1e-05, %v1093_v6  ;;  %v1092_v11 = vmul.f32 0.03125, %v1088_v8 }
 0xa41   :  { %2721 = vrsqrt.f32 %v1095_v5  ;;  %v1094_v3 = vadd.f32 1e-05, %v1092_v11 }
 0xa43   :  { %2723 = vrsqrt.f32 %v1094_v3 }
 0xa4e   :  { %v2722_v14 = vpop.eup %2721 }
 0xa4f   :  { %v1099_v2 = vmul.f32 %v2722_v14, %v1083_v49 }
 0xa50   :  { %v2724_v36 = vpop.eup %2723 }
 0xa51   :  { %v1098_v60 = vmul.f32 %v2724_v36, %v1082_v48  ;;  %v1105_v38 = vmul.f32 %v1103_v33, %v1099_v2 }
 0xa53   :  { %v1104_v9 = vmul.f32 %v1103_v33, %v1098_v60  ;;  %v3299_v12 = vadd.f32 %v2284_v59, %v1105_v38 }
 0xa55   :  { %v3297_v16 = vadd.f32 %v2284_v59, %v1104_v9 }
 0xa57   :  { %2563 = vmatprep.mubr.msk.f32.mxu1 %vm106_vm0, %v3297_v16 }
 0xa58   :  { %2564 = vmatmul.mubr.msk.f32.vlgmr.msra.gmra.mxu1 %vm106_vm0, %v3299_v12 }
 0xb18   :  { %v2565_v20 = vpop.f32.mrf.mxu1 }
 0xb19   :  { %v3308_v47 = vadd.f32 %v2565_v20, %v2292_v50 }
 0xb1a   :  { %v1200_v55 = vpop.f32.mrf.mxu1 }
 0xb1b   :  { %v3310_v15 = vadd.f32 %v2292_v50, %v1200_v55  ;;  %1221 = vrot.lane.b32.xlu1 %v3308_v47, %s2832_s0  ;;  %v1210_v42 = vmul.f32 %v3308_v47, %v2983_v17  ;;  %v1214_v17 = vmul.f32 %v3308_v47, %v3025_v29 }
 0xb1d   :  { %1219 = vrot.lane.b32.xlu0 %v3310_v15, %s2832_s0  ;;  %v1209_v26 = vmul.f32 %v3310_v15, %v2959_v10  ;;  %v1211_v49 = vmul.f32 %v3310_v15, %v2986_v19  ;;  %v1212_v10 = vmul.f32 %v3308_v47, %v3003_v23  ;;  %v1213_v52 = vmul.f32 %v3310_v15, %v3008_v25 }
 0xb1e   :  { %v1215_v19 = vmul.f32 %v3310_v15, %v3030_v31  ;;  %v1216_v23 = vmul.f32 %v3308_v47, %v3042_v34 }
 0xb1f   :  { %2570 = vmatprep.mubr.msk.f32.mxu1 %vm106_vm0, %v1209_v26 }
 0xb8d   :  { %v1222_v27 = vpop.permute.xlu1 %1221 }
 0xb8e   :  { %2566 = vmatprep.subr.msk.mxu1 %vm106_vm0, %v1222_v27 }
 0xb8f   :  { %2567 = vmatpush3.xpose.msk.msra.mxu1 %vm106_vm0, %v1222_v27  ;;  %v1220_v43 = vpop.permute.xlu0 %1219 }
 0xb90   :  { %2568 = vmatprep.subr.msk.mxu1 %vm106_vm0, %v1220_v43 }
 0xb93   :  { %2569 = vmatpush3.xpose.msk.msra.mxu1 %vm106_vm0, %v1220_v43 }
 0xb96   :  { %2571 = vmatmul.mubr.msk.f32.vlgmr.msra.gmra.mxu1 %vm106_vm0, %v1210_v42 }
 0xb97   :  { %2573 = vmatprep.mubr.msk.f32.mxu1 %vm106_vm0, %v1211_v49 }
 0xb9a   :  { %2574 = vmatmul.mubr.msk.f32.gmra.mxu1 %vm106_vm0, %v1212_v10 }
 0xb9b   :  { %2576 = vmatprep.mubr.msk.f32.mxu1 %vm106_vm0, %v1213_v52 }
 0xb9e   :  { %2577 = vmatmul.mubr.msk.f32.gmra.mxu1 %vm106_vm0, %v1214_v17 }
 0xb9f   :  { %2579 = vmatprep.mubr.msk.f32.mxu1 %vm106_vm0, %v1215_v19 }
 0xba2   :  { %2580 = vmatmul.mubr.msk.f32.gmra.mxu1 %vm106_vm0, %v1216_v23 }
 0xba3   :  { %2617 = vmatprep.mubr.msk.f32.mxu1 %vm106_vm0, %v3162_v21 }
 0xc56   :  { %v2572_v25 = vpop.f32.mrf.mxu1 }
 0xc57   :  { %v1323_v48 = vadd.f32 %v2572_v25, %v3054_v37 }
 0xc58   :  { %v1317_v53 = vpop.f32.mrf.mxu1 }
 0xc59   :  { %v1318_v29 = vadd.f32 %v1317_v53, %v3059_v39  ;;  %v1359_v31 = vsel %vm335_vm1, %v1323_v48, -inf }
 0xc5a   :  { %1360 = vmax.xlane.f32.xlu0 %v1359_v31  ;;  %v2575_v54 = vpop.f32.mrf.mxu1 }
 0xc5b   :  { %v1333_v58 = vadd.f32 %v2575_v54, %v3067_v44  ;;  %v1356_v7 = vsel %vm335_vm1, %v1318_v29, -inf }
 0xc5c   :  { %v1327_v34 = vpop.f32.mrf.mxu1  ;;  %1357 = vmax.xlane.f32.xlu1 %v1356_v7 }
 0xc5d   :  { %v1328_v41 = vadd.f32 %v1327_v34, %v3072_v46  ;;  %v1365_v21 = vsel %vm335_vm1, %v1333_v58, -inf }
 0xc5e   :  { %1366 = vmax.xlane.f32.xlu0 %v1365_v21  ;;  %v2578_v56 = vpop.f32.mrf.mxu1 }
 0xc5f   :  { %v1343_v37 = vadd.f32 %v2578_v56, %v3080_v51  ;;  %v1362_v39 = vsel %vm335_vm1, %v1328_v41, -inf }
 0xc60   :  { %v1337_v61 = vpop.f32.mrf.mxu1  ;;  %1363 = vmax.xlane.f32.xlu1 %v1362_v39 }
 0xc61   :  { %v1338_v0 = vadd.f32 %v1337_v61, %v3088_v57  ;;  %v1371_v44 = vsel %vm335_vm1, %v1343_v37, -inf }
 0xc62   :  { %1372 = vmax.xlane.f32.xlu0 %v1371_v44  ;;  %v2581_v4 = vpop.f32.mrf.mxu1 }
 0xc63   :  { %v1353_v6 = vadd.f32 %v2581_v4, %v3102_v1  ;;  %v1368_v46 = vsel %vm335_vm1, %v1338_v0, -inf }
 0xc64   :  { %v1347_v8 = vpop.f32.mrf.mxu1  ;;  %1369 = vmax.xlane.f32.xlu1 %v1368_v46 }
 0xc65   :  { %v1348_v5 = vadd.f32 %v1347_v8, %v3095_v62  ;;  %v1377_v51 = vsel %vm335_vm1, %v1353_v6, -inf }
 0xc66   :  { %1378 = vmax.xlane.f32.xlu0 %v1377_v51 }
 0xc67   :  { %v1374_v11 = vsel %vm335_vm1, %v1348_v5, -inf }
 0xc68   :  { %1375 = vmax.xlane.f32.xlu1 %v1374_v11 }
 0xce3   :  { %v1361_v3 = vpop.xlane.xlu0 %1360 }
 0xce4   :  { %v1381_v57 = vsub.f32 %v1323_v48, %v1361_v3 }
 0xce5   :  { %v1358_v14 = vpop.xlane.xlu1 %1357 }
 0xce6   :  { %v1390_v33 = vmul.f32 1.442695, %v1381_v57  ;;  %v1380_v2 = vsub.f32 %v1318_v29, %v1358_v14 }
 0xce7   :  { %v1367_v36 = vpop.xlane.xlu0 %1366 }
 0xce8   :  { %2725 = vpow2.f32 %v1390_v33  ;;  %v1388_v1 = vmul.f32 1.442695, %v1380_v2  ;;  %v1383_v60 = vsub.f32 %v1333_v58, %v1367_v36 }
 0xce9   :  { %v1364_v38 = vpop.xlane.xlu1 %1363 }
 0xcea   :  { %2727 = vpow2.f32 %v1388_v1  ;;  %v1394_v59 = vmul.f32 1.442695, %v1383_v60  ;;  %v1382_v9 = vsub.f32 %v1328_v41, %v1364_v38 }
 0xceb   :  { %v1373_v62 = vpop.xlane.xlu0 %1372 }
 0xcec   :  { %2729 = vpow2.f32 %v1394_v59  ;;  %v1392_v50 = vmul.f32 1.442695, %v1382_v9  ;;  %v1385_v20 = vsub.f32 %v1343_v37, %v1373_v62 }
 0xced   :  { %v1370_v55 = vpop.xlane.xlu1 %1369 }
 0xcee   :  { %2731 = vpow2.f32 %v1392_v50  ;;  %v1398_v26 = vmul.f32 1.442695, %v1385_v20  ;;  %v1384_v27 = vsub.f32 %v1338_v0, %v1370_v55 }
 0xcef   :  { %v1379_v43 = vpop.xlane.xlu0 %1378 }
 0xcf0   :  { %2733 = vpow2.f32 %v1398_v26  ;;  %v1396_v42 = vmul.f32 1.442695, %v1384_v27  ;;  %v1387_v49 = vsub.f32 %v1353_v6, %v1379_v43  ;;  %v2316_v26 = vld [vmem:[%s3563_s7 + $0x38] sm:$0xff]  ;;  %v2315_v27 = vld [vmem:[%s3563_s7 + $0x30] sm:$0xff]  ;;  %v2314_v43 = vld [vmem:[%s3563_s7 + $0x28] sm:$0xff] }
 0xcf1   :  { %v1376_v10 = vpop.xlane.xlu1 %1375 }
 0xcf2   :  { %2735 = vpow2.f32 %v1396_v42  ;;  %v1402_v52 = vmul.f32 1.442695, %v1387_v49  ;;  %v1386_v17 = vsub.f32 %v1348_v5, %v1376_v10  ;;  %v2313_v42 = vld [vmem:[%s3563_s7 + $0x20] sm:$0xff] }
 0xcf4   :  { %2737 = vpow2.f32 %v1402_v52  ;;  %v1400_v19 = vmul.f32 1.442695, %v1386_v17 }
 0xcf5   :  { %v2726_v23 = vpop.eup %2725 }
 0xcf6   :  { %2739 = vpow2.f32 %v1400_v19  ;;  %v1407_v25 = vsel %vm335_vm1, %v2726_v23, 0.0 }
 0xcf7   :  { %v2728_v48 = vpop.eup %2727  ;;  %1408 = vadd.xlane.f32.xlu0 %v1407_v25 }
 0xcf8   :  { %v1404_v53 = vsel %vm335_vm1, %v2728_v48, 0.0 }
 0xcf9   :  { %v2730_v29 = vpop.eup %2729  ;;  %1405 = vadd.xlane.f32.xlu1 %v1404_v53 }
 0xcfa   :  { %v1413_v31 = vsel %vm335_vm1, %v2730_v29, 0.0 }
 0xcfb   :  { %v2732_v54 = vpop.eup %2731  ;;  %1414 = vadd.xlane.f32.xlu0 %v1413_v31  ;;  %v2779_v31 = vld [vmem:[%s3559_s3] sm:$0xff] }
 0xcfc   :  { %v1410_v58 = vsel %vm335_vm1, %v2732_v54, 0.0 }
 0xcfd   :  { %v2734_v7 = vpop.eup %2733  ;;  %1411 = vadd.xlane.f32.xlu1 %v1410_v58  ;;  %v2780_v58 = vld [vmem:[%s3559_s3 + $0x20] sm:$0xff] }
 0xcfe   :  { %v1419_v34 = vsel %vm335_vm1, %v2734_v7, 0.0 }
 0xcff   :  { %v2736_v41 = vpop.eup %2735  ;;  %1420 = vadd.xlane.f32.xlu0 %v1419_v34  ;;  %v2781_v34 = vld [vmem:[%s3559_s3 + $0x8] sm:$0xff] }
 0xd00   :  { %v1416_v21 = vsel %vm335_vm1, %v2736_v41, 0.0 }
 0xd01   :  { %v2738_v56 = vpop.eup %2737  ;;  %1417 = vadd.xlane.f32.xlu1 %v1416_v21  ;;  %v2782_v21 = vld [vmem:[%s3559_s3 + $0x28] sm:$0xff] }
 0xd02   :  { %v1425_v37 = vsel %vm335_vm1, %v2738_v56, 0.0 }
 0xd03   :  { %v2740_v39 = vpop.eup %2739  ;;  %1426 = vadd.xlane.f32.xlu0 %v1425_v37 }
 0xd04   :  { %v1422_v61 = vsel %vm335_vm1, %v2740_v39, 0.0 }
 0xd05   :  { %1423 = vadd.xlane.f32.xlu1 %v1422_v61 }
 0xd16   :  { %1446 = vrot.lane.b32.xlu1 %v3308_v47, %s2833_s2 }
 0xd19   :  { %1444 = vrot.lane.b32.xlu0 %v3310_v15, %s2833_s2 }
 0xd80   :  { %v1409_v0 = vpop.xlane.xlu0 %1408 }
 0xd82   :  { %v1406_v44 = vpop.xlane.xlu1 %1405 }
 0xd83   :  { %2741 = vrcp.f32 %v1406_v44 }
 0xd84   :  { %v1415_v4 = vpop.xlane.xlu0 %1414  ;;  %2743 = vrcp.f32 %v1409_v0  ;;  %v2783_v0 = vld [vmem:[%s3559_s3 + $0x38] sm:$0xff] }
 0xd86   :  { %v1412_v6 = vpop.xlane.xlu1 %1411 }
 0xd87   :  { %2745 = vrcp.f32 %v1412_v6 }
 0xd88   :  { %v1421_v46 = vpop.xlane.xlu0 %1420  ;;  %2747 = vrcp.f32 %v1415_v4 }
 0xd8a   :  { %v1418_v8 = vpop.xlane.xlu1 %1417 }
 0xd8b   :  { %2749 = vrcp.f32 %v1418_v8 }
 0xd8c   :  { %2751 = vrcp.f32 %v1421_v46  ;;  %v1427_v5 = vpop.xlane.xlu0 %1426  ;;  %v2784_v46 = vld [vmem:[%s3559_s3 + $0x30] sm:$0xff] }
 0xd8e   :  { %v1424_v51 = vpop.xlane.xlu1 %1423 }
 0xd8f   :  { %2753 = vrcp.f32 %v1424_v51 }
 0xd90   :  { %v2742_v11 = vpop.eup %2741  ;;  %2755 = vrcp.f32 %v1427_v5  ;;  %v1445_v14 = vpop.permute.xlu0 %1444 }
 0xd91   :  { %v1436_v47 = vmul.f32 %v2742_v11, %v2728_v48  ;;  %v2744_v3 = vpop.eup %2743  ;;  %v2778_v48 = vld [vmem:[%s3559_s3 + $0x18] sm:$0xff] }
 0xd92   :  { %v1447_v15 = vpop.permute.xlu1 %1446  ;;  %v1437_v33 = vmul.f32 %v2744_v3, %v2726_v23  ;;  %v2777_v23 = vld [vmem:[%s3559_s3 + $0x10] sm:$0xff] }
 0xd93   :  { %2582 = vmatprep.subr.mxu0 %v1447_v15  ;;  %2586 = vmatprep.mubr.msk.f32.mxu0 %vm335_vm1, %v1436_v47  ;;  %v2322_v47 = vld [vmem:[%s3564_s8 + $0x38] sm:$0xff]  ;;  %v2321_v3 = vld [vmem:[%s3564_s8 + $0x30] sm:$0xff] }
 0xd94   :  { %v2746_v57 = vpop.eup %2745  ;;  %2583 = vmatpush3.msra.mxu0 %v1447_v15  ;;  %2609 = vmatprep.subr.mxu1 %v2322_v47  ;;  %v2320_v15 = vld [vmem:[%s3564_s8 + $0x28] sm:$0xff] }
 0xd95   :  { %2584 = vmatprep.subr.mxu0 %v1445_v14  ;;  %v1438_v2 = vmul.f32 %v2746_v57, %v2732_v54  ;;  %v2748_v36 = vpop.eup %2747  ;;  %2610 = vmatpush3.msra.mxu1 %v2322_v47  ;;  %v2319_v57 = vld [vmem:[%s3564_s8 + $0x20] sm:$0xff] }
 0xd96   :  { %2585 = vmatpush3.msra.mxu0 %v1445_v14  ;;  %v1439_v60 = vmul.f32 %v2748_v36, %v2730_v29  ;;  %2611 = vmatprep.subr.mxu1 %v2321_v3  ;;  %v3437_v14 = vld [vmem:[%s3568_s12 + $0x10] sm:$0xff] }
 0xd97   :  { %2587 = vmatmul.mubr.msk.f32.vlgmr.msra.gmra.mxu0 %vm335_vm1, %v1437_v33  ;;  %2598 = vmatprep.subr.mxu0 %v2316_v26  ;;  %v1601_v33 = vrot.slane %v3437_v14, %v579_v40 }
 0xd98   :  { %v2750_v1 = vpop.eup %2749  ;;  %2589 = vmatprep.mubr.msk.f32.mxu0 %vm335_vm1, %v1438_v2  ;;  %2599 = vmatpush3.msra.mxu0 %v2316_v26 }
 0xd99   :  { %v1440_v38 = vmul.f32 %v2750_v1, %v2736_v41  ;;  %v2752_v59 = vpop.eup %2751  ;;  %2600 = vmatprep.subr.mxu0 %v2315_v27  ;;  %2612 = vmatpush3.msra.mxu1 %v2321_v3  ;;  %v2328_v3 = vld [vmem:[%s3565_s9 + $0x38] sm:$0xff] }
 0xd9a   :  { %v1441_v62 = vmul.f32 %v2752_v59, %v2734_v7  ;;  %2601 = vmatpush3.msra.mxu0 %v2315_v27  ;;  %2613 = vmatprep.subr.mxu1 %v2320_v15 }
 0xd9b   :  { %2590 = vmatmul.mubr.msk.f32.gmra.mxu0 %vm335_vm1, %v1439_v60  ;;  %2602 = vmatprep.subr.mxu0 %v2314_v43 }
 0xd9c   :  { %v2754_v9 = vpop.eup %2753  ;;  %2592 = vmatprep.mubr.msk.f32.mxu0 %vm335_vm1, %v1440_v38  ;;  %2603 = vmatpush3.msra.mxu0 %v2314_v43 }
 0xd9d   :  { %v1442_v50 = vmul.f32 %v2754_v9, %v2740_v39  ;;  %v2756_v20 = vpop.eup %2755  ;;  %2604 = vmatprep.subr.mxu0 %v2313_v42  ;;  %2614 = vmatpush3.msra.mxu1 %v2320_v15  ;;  %v2327_v15 = vld [vmem:[%s3565_s9 + $0x30] sm:$0xff] }
 0xd9e   :  { %v1443_v55 = vmul.f32 %v2756_v20, %v2738_v56  ;;  %2605 = vmatpush3.msra.mxu0 %v2313_v42  ;;  %2615 = vmatprep.subr.mxu1 %v2319_v57 }
 0xd9f   :  { %2593 = vmatmul.mubr.msk.f32.gmra.mxu0 %vm335_vm1, %v1441_v62  ;;  %2616 = vmatpush3.msra.mxu1 %v2319_v57  ;;  %v2326_v57 = vld [vmem:[%s3565_s9 + $0x28] sm:$0xff] }
 0xda0   :  { %2595 = vmatprep.mubr.msk.f32.mxu0 %vm335_vm1, %v1442_v50  ;;  %2618 = vmatmul.mubr.msk.f32.vlgmr.msra.gmra.mxu1 %vm106_vm0, %v3175_v32 }
 0xda1   :  { %2620 = vmatprep.subr.mxu0 %v2328_v3 }
 0xda3   :  { %2596 = vmatmul.mubr.msk.f32.gmra.mxu0 %vm335_vm1, %v1443_v55 }
 0xe57   :  { %v2588_v49 = vpop.f32.mrf.mxu0 }
 0xe58   :  { %v1580_v41 = vmul.f32 %v2781_v34, %v2588_v49 }
 0xe59   :  { %v1540_v10 = vpop.f32.mrf.mxu0 }
 0xe5a   :  { %v1579_v54 = vmul.f32 %v2779_v31, %v1540_v10  ;;  %v1720_v31 = vrot.slane %v3437_v14, %v699_v28 }
 0xe5b   :  { %v2591_v52 = vpop.f32.mrf.mxu0 }
 0xe5c   :  { %v1582_v53 = vmul.f32 %v2778_v48, %v2591_v52 }
 0xe5d   :  { %v1550_v17 = vpop.f32.mrf.mxu0 }
 0xe5e   :  { %v1581_v25 = vmul.f32 %v2777_v23, %v1550_v17  ;;  %v1588_v61 = vadd.f32 %v1582_v53, %v1580_v41  ;;  %v1731_v23 = vrot.slane %v3437_v14, %v709_v22 }
 0xe5f   :  { %v2594_v19 = vpop.f32.mrf.mxu0 }
 0xe60   :  { %v1584_v56 = vmul.f32 %v2782_v21, %v2594_v19  ;;  %v1587_v39 = vadd.f32 %v1581_v25, %v1579_v54  ;;  %v1714_v25 = vrot.slane %v3437_v14, %v693_v24  ;;  %v2619_v53 = vpop.f32.mrf.mxu1 }
 0xe61   :  { %v1560_v29 = vpop.f32.mrf.mxu0 }
 0xe62   :  { %v1583_v7 = vmul.f32 %v2780_v58, %v1560_v29  ;;  %v1590_v5 = vadd.f32 %v1588_v61, %v1584_v56  ;;  %v1804_v58 = vadd.f32 %v2619_v53, %v1731_v23  ;;  %v1798_v41 = vpop.f32.mrf.mxu1 }
 0xe63   :  { %v2597_v37 = vpop.f32.mrf.mxu0 }
 0xe64   :  { %v1586_v44 = vmul.f32 %v2783_v0, %v2597_v37  ;;  %v1589_v6 = vadd.f32 %v1587_v39, %v1583_v7  ;;  %v1799_v37 = vadd.f32 %v1798_v41, %v1731_v23 }
 0xe65   :  { %v1570_v4 = vpop.f32.mrf.mxu0 }
 0xe66   :  { %v1585_v8 = vmul.f32 %v2784_v46, %v1570_v4  ;;  %v1592_v11 = vadd.f32 %v1590_v5, %v1586_v44 }
 0xe68   :  { %v1591_v51 = vadd.f32 %v1589_v6, %v1585_v8 }
 0xe6a   :  { %2606 = vmatprep.mubr.msk.f32.mxu0 %vm106_vm0, %v1591_v51 }
 0xe6b   :  { %2607 = vmatmul.mubr.msk.f32.vlgmr.msra.gmra.mxu0 %vm106_vm0, %v1592_v11 }
 0xe6c   :  { %2621 = vmatpush3.msra.mxu0 %v2328_v3 }
 0xe6d   :  { %2622 = vmatprep.subr.mxu0 %v2327_v15 }
 0xe6e   :  { %2623 = vmatpush3.msra.mxu0 %v2327_v15 }
 0xe6f   :  { %2624 = vmatprep.subr.mxu0 %v2326_v57 }
 0xe70   :  { %2625 = vmatpush3.msra.mxu0 %v2326_v57 }
 0xf2b   :  { %v2608_v2 = vpop.f32.mrf.mxu0 }
 0xf2c   :  { %v1680_v36 = vadd.f32 %v2608_v2, %v1601_v33 }
 0xf2d   :  { %v1674_v1 = vpop.f32.mrf.mxu0 }
 0xf2e   :  { %v1675_v60 = vadd.f32 %v1674_v1, %v1601_v33  ;;  %v1684_v38 = vadd.f32 %v1680_v36, %v3299_v12  ;;  %v2325_v33 = vld [vmem:[%s3565_s9 + $0x20] sm:$0xff] }
 0xf2f   :  { %2626 = vmatprep.subr.mxu0 %v2325_v33 }
 0xf30   :  { %v1688_v59 = vsel %vm106_vm0, %v1684_v38, 0.0  ;;  %v1683_v9 = vadd.f32 %v1675_v60, %v3297_v16  ;;  %2627 = vmatpush3.msra.mxu0 %v2325_v33 }
 0xf31   :  { %1689 = vadd.xlane.f32.xlu0 %v1688_v59 }
 0xf32   :  { %v1685_v32 = vsel %vm106_vm0, %v1683_v9, 0.0 }
 0xf33   :  { %1686 = vadd.xlane.f32.xlu1 %v1685_v32  ;;  %v1838_v32 = vrot.slane %v3437_v14, %v822_v18  ;;  %v2339_v18 = vld [vmem:[%s3567_s11 + $0x78] sm:$0xff] }
 0xf34   :  { %2631 = vmatprep.subr.mxu1 %v2339_v18 }
 0xf35   :  { %2632 = vmatpush3.msra.mxu1 %v2339_v18 }
 0xfba   :  { %v1690_v62 = vpop.xlane.xlu0 %1689 }
 0xfbb   :  { %v1692_v50 = vmul.f32 0.03125, %v1690_v62 }
 0xfbc   :  { %v1687_v20 = vpop.xlane.xlu1 %1686 }
 0xfbd   :  { %v1694_v55 = vsub.f32 %v1684_v38, %v1692_v50  ;;  %v1691_v26 = vmul.f32 0.03125, %v1687_v20 }
 0xfbf   :  { %v1693_v40 = vsub.f32 %v1683_v9, %v1691_v26  ;;  %v1696_v27 = vmul.f32 %v1694_v55, %v1694_v55  ;;  %v1844_v26 = vrot.slane %v3437_v14, %v828_v35  ;;  %v2338_v35 = vld [vmem:[%s3567_s11 + $0x70] sm:$0xff] }
 0xfc0   :  { %2633 = vmatprep.subr.mxu1 %v2338_v35 }
 0xfc1   :  { %v1700_v43 = vsel %vm106_vm0, %v1696_v27, 0.0  ;;  %v1695_v42 = vmul.f32 %v1693_v40, %v1693_v40  ;;  %2634 = vmatpush3.msra.mxu1 %v2338_v35 }
 0xfc2   :  { %1701 = vadd.xlane.f32.xlu0 %v1700_v43 }
 0xfc3   :  { %v1697_v12 = vsel %vm106_vm0, %v1695_v42, 0.0  ;;  %v2337_v42 = vld [vmem:[%s3567_s11 + $0x68] sm:$0xff] }
 0xfc4   :  { %1698 = vadd.xlane.f32.xlu1 %v1697_v12  ;;  %2635 = vmatprep.subr.mxu1 %v2337_v42  ;;  %v2336_v12 = vld [vmem:[%s3567_s11 + $0x60] sm:$0xff] }
 0xfc5   :  { %2636 = vmatpush3.msra.mxu1 %v2337_v42 }
 0xfc6   :  { %2637 = vmatprep.subr.mxu1 %v2336_v12 }
 0xfc7   :  { %2638 = vmatpush3.msra.mxu1 %v2336_v12 }
0x104b   :  { %v1702_v49 = vpop.xlane.xlu0 %1701 }
0x104c   :  { %v1704_v16 = vmul.f32 0.03125, %v1702_v49  ;;  %v2335_v49 = vld [vmem:[%s3567_s11 + $0x58] sm:$0xff] }
0x104d   :  { %v1699_v10 = vpop.xlane.xlu1 %1698  ;;  %2639 = vmatprep.subr.mxu1 %v2335_v49 }
0x104e   :  { %v1706_v52 = vadd.f32 1e-05, %v1704_v16  ;;  %v1703_v17 = vmul.f32 0.03125, %v1699_v10  ;;  %2640 = vmatpush3.msra.mxu1 %v2335_v49  ;;  %v2334_v16 = vld [vmem:[%s3567_s11 + $0x50] sm:$0xff]  ;;  %v2333_v10 = vld [vmem:[%s3567_s11 + $0x48] sm:$0xff] }
0x104f   :  { %2641 = vmatprep.subr.mxu1 %v2334_v16 }
0x1050   :  { %2757 = vrsqrt.f32 %v1706_v52  ;;  %v1705_v19 = vadd.f32 1e-05, %v1703_v17  ;;  %2642 = vmatpush3.msra.mxu1 %v2334_v16  ;;  %v2332_v52 = vld [vmem:[%s3567_s11 + $0x40] sm:$0xff] }
0x1051   :  { %2643 = vmatprep.subr.mxu1 %v2333_v10  ;;  %v2329_v17 = vld [vmem:[#allocation2 + $0x1] ss:$0 sm:$0xff] }
0x1052   :  { %2759 = vrsqrt.f32 %v1705_v19  ;;  %2644 = vmatpush3.msra.mxu1 %v2333_v10  ;;  %v2007_v10 = vrot.slane %v3437_v14, %v988_v30 }
0x1053   :  { %2645 = vmatprep.subr.mxu1 %v2332_v52 }
0x1054   :  { %2646 = vmatpush3.msra.mxu1 %v2332_v52 }
0x105d   :  { %v2758_v48 = vpop.eup %2757 }
0x105e   :  { %v1710_v29 = vmul.f32 %v2758_v48, %v1694_v55 }
0x105f   :  { %v2760_v54 = vpop.eup %2759 }
0x1060   :  { %v1716_v7 = vmul.f32 %v1714_v25, %v1710_v29  ;;  %v1709_v34 = vmul.f32 %v2760_v54, %v1693_v40 }
0x1062   :  { %v1722_v21 = vadd.f32 %v1720_v31, %v1716_v7  ;;  %v1715_v56 = vmul.f32 %v1714_v25, %v1709_v34 }
0x1064   :  { %v1808_v22 = vadd.f32 %v1804_v58, %v1722_v21  ;;  %v1721_v39 = vadd.f32 %v1720_v31, %v1715_v56 }
0x1066   :  { %v1812_v61 = vsel %vm106_vm0, %v1808_v22, 0.0  ;;  %v1807_v24 = vadd.f32 %v1799_v37, %v1721_v39 }
0x1067   :  { %1813 = vadd.xlane.f32.xlu0 %v1812_v61 }
0x1068   :  { %v1809_v0 = vsel %vm106_vm0, %v1807_v24, 0.0 }
0x1069   :  { %1810 = vadd.xlane.f32.xlu1 %v1809_v0 }
0x10f0   :  { %v1814_v44 = vpop.xlane.xlu0 %1813 }
0x10f1   :  { %v1816_v4 = vmul.f32 0.03125, %v1814_v44 }
0x10f2   :  { %v1811_v28 = vpop.xlane.xlu1 %1810 }
0x10f3   :  { %v1818_v6 = vsub.f32 %v1808_v22, %v1816_v4  ;;  %v1815_v46 = vmul.f32 0.03125, %v1811_v28 }
0x10f5   :  { %v1817_v8 = vsub.f32 %v1807_v24, %v1815_v46  ;;  %v1820_v5 = vmul.f32 %v1818_v6, %v1818_v6 }
0x10f7   :  { %v1824_v51 = vsel %vm106_vm0, %v1820_v5, 0.0  ;;  %v1819_v11 = vmul.f32 %v1817_v8, %v1817_v8 }
0x10f8   :  { %1825 = vadd.xlane.f32.xlu0 %v1824_v51 }
0x10f9   :  { %v1821_v47 = vsel %vm106_vm0, %v1819_v11, 0.0 }
0x10fa   :  { %1822 = vadd.xlane.f32.xlu1 %v1821_v47 }
0x1181   :  { %v1826_v2 = vpop.xlane.xlu0 %1825 }
0x1182   :  { %v1828_v36 = vmul.f32 0.03125, %v1826_v2 }
0x1183   :  { %v1823_v1 = vpop.xlane.xlu1 %1822 }
0x1184   :  { %v1830_v60 = vadd.f32 1e-05, %v1828_v36  ;;  %v1827_v38 = vmul.f32 0.03125, %v1823_v1 }
0x1186   :  { %2761 = vrsqrt.f32 %v1830_v60  ;;  %v1829_v59 = vadd.f32 1e-05, %v1827_v38 }
0x1188   :  { %2763 = vrsqrt.f32 %v1829_v59 }
0x1193   :  { %v2762_v9 = vpop.eup %2761 }
0x1194   :  { %v1834_v62 = vmul.f32 %v2762_v9, %v1818_v6 }
0x1195   :  { %v2764_v50 = vpop.eup %2763 }
0x1196   :  { %v1833_v20 = vmul.f32 %v2764_v50, %v1817_v8  ;;  %v1840_v55 = vmul.f32 %v1838_v32, %v1834_v62 }
0x1198   :  { %v1839_v40 = vmul.f32 %v1838_v32, %v1833_v20  ;;  %v3481_v43 = vadd.f32 %v1844_v26, %v1840_v55 }
0x119a   :  { %v3479_v27 = vadd.f32 %v1844_v26, %v1839_v40 }
0x119c   :  { %2628 = vmatprep.mubr.msk.f32.mxu0 %vm106_vm0, %v3479_v27 }
0x119d   :  { %2629 = vmatmul.mubr.msk.f32.vlgmr.msra.gmra.mxu0 %vm106_vm0, %v3481_v43 }
0x125d   :  { %v2630_v19 = vpop.f32.mrf.mxu0 }
0x125e   :  { %v1938_v23 = vadd.f32 %v2630_v19, %v2329_v17 }
0x125f   :  { %v1932_v25 = vpop.f32.mrf.mxu0 }
0x1260   :  { %v1944_v48 = vmul.f32 0.70710677, %v1938_v23  ;;  %v1933_v53 = vadd.f32 %v2329_v17, %v1932_v25  ;;  %v1942_v12 = vmul.f32 0.5, %v1938_v23 }
0x1262   :  { %v1950_v29 = vand.u32 2147483647, %v1944_v48  ;;  %v1943_v31 = vmul.f32 0.70710677, %v1933_v53  ;;  %vm1946_vm5 = vcmp.ge.f32.partialorder %v1944_v48, 0.0  ;;  %v1941_v35 = vmul.f32 0.5, %v1933_v53 }
0x1263   :  { %v1948_v62 = vsel %vm1946_vm5, 1.0, %v2834_v63 }
0x1264   :  { %v1952_v54 = vmul.f32 0.3275911, %v1950_v29  ;;  %v1949_v58 = vand.u32 2147483647, %v1943_v31  ;;  %v1978_v21 = vsub.f32 0.0, %v1950_v29  ;;  %vm1945_vm6 = vcmp.ge.f32.partialorder %v1943_v31, 0.0 }
0x1265   :  { %v1947_v26 = vsel %vm1945_vm6, 1.0, %v2834_v63 }
0x1266   :  { %v1954_v7 = vadd.f32 1.0, %v1952_v54  ;;  %v1951_v34 = vmul.f32 0.3275911, %v1949_v58  ;;  %v1977_v56 = vsub.f32 0.0, %v1949_v58  ;;  %v1980_v37 = vmul.f32 %v1978_v21, %v1950_v29 }
0x1268   :  { %2765 = vrcp.f32 %v1954_v7  ;;  %v1953_v41 = vadd.f32 1.0, %v1951_v34  ;;  %v1979_v39 = vmul.f32 %v1977_v56, %v1949_v58  ;;  %v1983_v24 = vmul.f32 1.442695, %v1980_v37  ;;  %v2131_v56 = vld [vmem:[%s3569_s13 + $0x10] sm:$0xff]  ;;  %v2130_v37 = vld [vmem:[%s3569_s13 + $0x8] sm:$0xff] }
0x126a   :  { %2767 = vrcp.f32 %v1953_v41  ;;  %v1981_v28 = vmul.f32 1.442695, %v1979_v39  ;;  %v2222_v39 = vld [vmem:[%s3560_s4 + $0x8] sm:$0xff] }
0x126b   :  { %2769 = vpow2.f32 %v1983_v24  ;;  %v2835_v24 = vmov 0  }
0x126c   :  { %2771 = vpow2.f32 %v1981_v28  ;;  %2672 = vset.pattern.permute.xlu0 %v2835_v24  ;;  %2671 = vset.pattern.permute.xlu1 %v2835_v24 }
0x1275   :  { %v2766_v22 = vpop.eup %2765 }
0x1276   :  { %v1960_v61 = vmul.f32 1.0614054, %v2766_v22 }
0x1277   :  { %v2768_v0 = vpop.eup %2767 }
0x1278   :  { %v1962_v44 = vadd.f32 -1.4531521, %v1960_v61  ;;  %v1959_v4 = vmul.f32 1.0614054, %v2768_v0  ;;  %v2770_v1 = vpop.eup %2769  ;;  %v2221_v61 = vld [vmem:[%s3560_s4] sm:$0xff] }
0x1279   :  { %v2772_v9 = vpop.eup %2771 }
0x127a   :  { %v1964_v6 = vmul.f32 %v2766_v22, %v1962_v44  ;;  %v1961_v46 = vadd.f32 -1.4531521, %v1959_v4 }
0x127c   :  { %v1966_v8 = vadd.f32 1.4214138, %v1964_v6  ;;  %v1963_v5 = vmul.f32 %v2768_v0, %v1961_v46 }
0x127e   :  { %v1968_v51 = vmul.f32 %v2766_v22, %v1966_v8  ;;  %v1965_v11 = vadd.f32 1.4214138, %v1963_v5  ;;  %v2120_v5 = vrot.slane %v3437_v14, %v1102_v13 }
0x1280   :  { %v1970_v47 = vadd.f32 -0.28449672, %v1968_v51  ;;  %v1967_v3 = vmul.f32 %v2768_v0, %v1965_v11 }
0x1282   :  { %v1972_v15 = vmul.f32 %v2766_v22, %v1970_v47  ;;  %v1969_v57 = vadd.f32 -0.28449672, %v1967_v3 }
0x1284   :  { %v1974_v33 = vadd.f32 0.2548296, %v1972_v15  ;;  %v1971_v2 = vmul.f32 %v2768_v0, %v1969_v57  ;;  %v2342_v15 = vld [vmem:[%s3568_s12 + $0x18] ss:$0 sm:$0xff]  ;;  %s2805_s12 = scalar_lea.vmem %s2243_s6, 256 }
0x1285   :  { %p2806_p5 = scmp.ne.s32.totalorder %s2243_s6, %s2805_s12  ;;  %p2811_p7 = scmp.lt.s32.totalorder %s2805_s12, %s2805_s12 }
0x1286   :  { %v1976_v36 = vmul.f32 %v2766_v22, %v1974_v33  ;;  %v1973_v60 = vadd.f32 0.2548296, %v1971_v2  ;;  %v2129_v22 = vld [vmem:[%s3569_s13] sm:$0xff] }
0x1287   :  { %p2812_p8 = por %p2811_p7, %p2810_p6 }
0x1288   :  { %v1986_v38 = vmul.f32 %v2770_v1, %v1976_v36  ;;  %v1975_v59 = vmul.f32 %v2768_v0, %v1973_v60 }
0x1289   :  { %p2813_p9 = pnand %p2812_p8, %p2806_p5 }
0x128a   :  { %v1988_v32 = vsub.f32 1.0, %v1986_v38  ;;  %v1985_v50 = vmul.f32 %v2772_v9, %v1975_v59 }
0x128c   :  { %v1990_v20 = vmul.f32 %v1988_v32, %v1948_v62  ;;  %v1987_v55 = vsub.f32 1.0, %v1985_v50 }
0x128e   :  { %v1989_v40 = vmul.f32 %v1987_v55, %v1947_v26  ;;  %v1992_v18 = vadd.f32 1.0, %v1990_v20 }
0x1290   :  { %v1991_v42 = vadd.f32 1.0, %v1989_v40  ;;  %v1994_v16 = vmul.f32 %v1992_v18, %v1942_v12 }
0x1292   :  { %v1993_v49 = vmul.f32 %v1991_v42, %v1941_v35 }
0x1294   :  { %2647 = vmatprep.mubr.msk.f32.mxu1 %vm990_vm4, %v1993_v49 }
0x1295   :  { %2648 = vmatmul.mubr.msk.f32.vlgmr.msra.gmra.mxu1 %vm990_vm4, %v1994_v16 }
0x1355   :  { %v2649_v52 = vpop.f32.mrf.mxu1 }
0x1356   :  { %v2086_v17 = vadd.f32 %v2649_v52, %v2007_v10 }
0x1357   :  { %v2080_v19 = vpop.f32.mrf.mxu1 }
0x1358   :  { %v2081_v25 = vadd.f32 %v2080_v19, %v2007_v10  ;;  %v2090_v63 = vadd.f32 %v2086_v17, %v3481_v43 }
0x135a   :  { %v2094_v48 = vsel %vm106_vm0, %v2090_v63, 0.0  ;;  %v2089_v23 = vadd.f32 %v2081_v25, %v3479_v27  ;;  %v2132_v27 = vld [vmem:[%s3569_s13 + $0x18] sm:$0xff] }
0x135b   :  { %2095 = vadd.xlane.f32.xlu0 %v2094_v48  ;;  %2650 = vmatprep.subr.mxu0 %v2132_v27 }
0x135c   :  { %v2091_v53 = vsel %vm106_vm0, %v2089_v23, 0.0  ;;  %2651 = vmatpush3.msra.mxu0 %v2132_v27 }
0x135d   :  { %2092 = vadd.xlane.f32.xlu1 %v2091_v53  ;;  %2652 = vmatprep.subr.mxu0 %v2131_v56 }
0x135e   :  { %2653 = vmatpush3.msra.mxu0 %v2131_v56 }
0x135f   :  { %2654 = vmatprep.subr.mxu0 %v2130_v37 }
0x1360   :  { %2655 = vmatpush3.msra.mxu0 %v2130_v37 }
0x1361   :  { %2656 = vmatprep.subr.mxu0 %v2129_v22 }
0x1362   :  { %2657 = vmatpush3.msra.mxu0 %v2129_v22 }
0x13e4   :  { %v2096_v29 = vpop.xlane.xlu0 %2095 }
0x13e5   :  { %v2098_v31 = vmul.f32 0.03125, %v2096_v29 }
0x13e6   :  { %v2093_v54 = vpop.xlane.xlu1 %2092 }
0x13e7   :  { %v2100_v58 = vsub.f32 %v2090_v63, %v2098_v31  ;;  %v2097_v7 = vmul.f32 0.03125, %v2093_v54 }
0x13e9   :  { %v2099_v30 = vsub.f32 %v2089_v23, %v2097_v7  ;;  %v2102_v34 = vmul.f32 %v2100_v58, %v2100_v58 }
0x13eb   :  { %v2106_v41 = vsel %vm106_vm0, %v2102_v34, 0.0  ;;  %v2101_v21 = vmul.f32 %v2099_v30, %v2099_v30 }
0x13ec   :  { %2107 = vadd.xlane.f32.xlu0 %v2106_v41 }
0x13ed   :  { %v2103_v43 = vsel %vm106_vm0, %v2101_v21, 0.0 }
0x13ee   :  { %2104 = vadd.xlane.f32.xlu1 %v2103_v43 }
0x13ff   :  { %2225 = vperm.xlu1 %2671, %v2221_v61  }
0x1402   :  { %2230 = vperm.xlu0 %2672, %v2222_v39  }
0x1475   :  { %v2108_v0 = vpop.xlane.xlu0 %2107 }
0x1476   :  { %v2110_v44 = vmul.f32 0.03125, %v2108_v0 }
0x1477   :  { %v2105_v4 = vpop.xlane.xlu1 %2104 }
0x1478   :  { %v2112_v28 = vadd.f32 1e-05, %v2110_v44  ;;  %v2109_v6 = vmul.f32 0.03125, %v2105_v4 }
0x147a   :  { %2773 = vrsqrt.f32 %v2112_v28  ;;  %v2111_v46 = vadd.f32 1e-05, %v2109_v6 }
0x147b   :  { %v2226_v60 = vpop.permute.xlu1 %2225 }
0x147c   :  { %2775 = vrsqrt.f32 %v2111_v46 }
0x147d   :  { %v2231_v14 = vpop.permute.xlu0 %2230 }
0x1487   :  { %v2774_v8 = vpop.eup %2773 }
0x1488   :  { %v2116_v51 = vmul.f32 %v2774_v8, %v2100_v58 }
0x1489   :  { %v2776_v11 = vpop.eup %2775 }
0x148a   :  { %v2115_v47 = vmul.f32 %v2776_v11, %v2099_v30  ;;  %v2122_v3 = vmul.f32 %v2120_v5, %v2116_v51 }
0x148c   :  { %v2121_v57 = vmul.f32 %v2120_v5, %v2115_v47  ;;  %v2128_v2 = vadd.f32 %v2342_v15, %v2122_v3 }
0x148e   :  { %v2127_v33 = vadd.f32 %v2342_v15, %v2121_v57 }
0x1490   :  { %2658 = vmatprep.mubr.msk.f32.mxu0 %vm106_vm0, %v2127_v33 }
0x1491   :  { %2659 = vmatmul.mubr.msk.f32.vlgmr.msra.gmra.mxu0 %vm106_vm0, %v2128_v2 }
0x1551   :  { %v2660_v13 = vpop.f32.mrf.mxu0 }
0x1552   :  { %v2218_v36 = vadd.f32 %v2660_v13, %v2343_v45 }
0x1553   :  { %v2212_v1 = vpop.f32.mrf.mxu0 }
0x1554   :  { %v2234_v38 = vmul.f32 %v2231_v14, %v2218_v36  ;;  %v2213_v59 = vadd.f32 %v2343_v45, %v2212_v1 }
0x1556   :  { %2236 = vst [vmem:[#allocation5 + $0x8] sm:$0xff] %v2234_v38  ;;  %v2233_v9 = vmul.f32 %v2226_v60, %v2213_v59 }
0x1558   :  { %2235 = vst [vmem:[#allocation5] sm:$0xff] %v2233_v9 }
0x1559   :  { %2816 = shalt.err (!%p2813_p9)
}
0x155a   :  { %s2837_s14 = smov 128   ;;  %s2838_s0 = smov 8  }
0x155b   :  { %2248 = dma.vmem_to_hbm [thread:$0]  %s2243_s6, 256, %s3571_s15, [#allocation4], %s2837_s14, %s2837_s14, %s2838_s0  }
0x155c   :  { %2827 = dma.done.wait [#allocation4], 256  }
0x155d   :  { %2828 = vsyncadd [#allocation4], 4294967040 }
0x155e   :  { %2252 = vsyncpa [#allocation3], 1 }
0x155f   :  { %2253 = vsyncpa [#allocation4], 1 }

</bundles_post_ra>
